<compile_context>
chip_gen: v5e
topology: v5e:2x2
jax: 0.10.0
libtpu: 0.0.40
codegen_flags: <defaults>
</compile_context>

<pallas_src>
import functools

import jax
import jax.numpy as jnp
from jax.experimental import pallas as pl
from jax.experimental.pallas import tpu as pltpu

_IMAGENET_MEAN = (0.485, 0.456, 0.406)
_IMAGENET_STD = (0.229, 0.224, 0.225)


def _round_up(x, m):
    return (x + m - 1) // m * m


# ---------------------------------------------------------------------------
# Fused stem kernel: (normalized) 3x3 conv as 18 shifted MXU dots + frozen BN + ReLU.
# ---------------------------------------------------------------------------
def _stem_conv_kernel(x_ref, w_ref, scale_ref, shift_ref, o_ref, *,
                      tile_h, w_half, compute_dtype):
    """One (batch, row-tile) grid step.

    x_ref     : (1, H_pad+2, W_pad//2+1, 6) f32 — whole mean-subtracted, zero-padded image,
                adjacent columns paired into the lane dim (padded col = 2*q + p, chan = s%3).
    w_ref     : (18, 3, 2*Cout)  compute_dtype — per-tap (Cin x 2*Cout) weight slices of the
                block-diagonal [[W/std, 0], [0, W/std]] matrix (taps ordered pair, ky, kx).
    scale_ref : (1, 2*Cout) f32 frozen-BN scale (duplicated for the column pair).
    shift_ref : (1, 2*Cout) f32 frozen-BN shift  (duplicated for the column pair).
    o_ref     : (1, tile_h * W_pad//2, 2*Cout) f32 — 128-lane dense output tile.
    """
    t = pl.program_id(1)
    r0 = pl.multiple_of(t * tile_h, 8)          # first output row of this tile
    m2 = tile_h * w_half
    acc = jnp.zeros((m2, o_ref.shape[-1]), jnp.float32)

    # 3x3 conv == 9 shifted dots, x2 for the even/odd output-column pair packed in lanes.
    for pair in range(2):                       # output-column parity
        for ky in range(3):
            for kx in range(3):
                d = kx + pair                   # padded-column offset for this tap (0..3)
                slab = x_ref[0,
                             pl.ds(r0 + ky, tile_h),
                             (d // 2):(d // 2) + w_half,
                             (d % 2) * 3:(d % 2) * 3 + 3]   # (tile_h, w_half, 3)
                lhs = slab.reshape(m2, 3).astype(compute_dtype)
                tap = pair * 9 + ky * 3 + kx
                acc += jnp.dot(lhs, w_ref[tap],
                               preferred_element_type=jnp.float32)

    y = acc * scale_ref[...] + shift_ref[...]    # frozen BN affine, f32 epilogue
    o_ref[0, :, :] = jnp.maximum(y, 0.0).astype(o_ref.dtype)


def stem_conv3x3_bn_relu_nhwc(x_nhwc, conv_w, bn_scale, bn_shift, *,
                              mean=_IMAGENET_MEAN, std=_IMAGENET_STD,
                              target_rows=2048, compute_dtype=jnp.bfloat16):
    """Fused normalize + conv1(3x3, s1, p1, no bias) + frozen BN + ReLU, NHWC in/out.

    x_nhwc  : [N, H, W, 3] float32
    conv_w  : [Cout, 3, 3, 3] float32 (PyTorch OIHW conv weight layout)
    bn_scale, bn_shift : [Cout] float32  (gamma/sqrt(var+eps), beta - mean*scale)
    returns : [N, H, W, Cout] float32
    """
    n, h, w, cin = x_nhwc.shape
    cout, cin_w, kh, kw = conv_w.shape
    assert cin == 3 and cin_w == 3 and kh == 3 and kw == 3

    mean = jnp.asarray(mean, jnp.float32)
    std = jnp.asarray(std, jnp.float32)

    # --- normalization folded into the conv ----------------------------------------------
    # (x - mean)/std conv W  ==  (x - mean) conv (W/std).  The mean subtraction happens
    # BEFORE zero-padding, so the 1-pixel border matches torchvision's normalize -> pad0 ->
    # conv exactly (the perf-review correctness concern).  It fuses with the pad on the
    # small 3-channel stream; there is no separate normalization pass/kernel.
    xz = x_nhwc.astype(jnp.float32) - mean

    # --- tiling geometry ------------------------------------------------------------------
    w_pad = _round_up(w, 16)                 # keep W_pad/2 a multiple of 8 (clean vreg layout)
    w_half = w_pad // 2
    tile_h = _round_up(max(1, -(-target_rows // w_pad)), 8)
    tile_h = min(tile_h, _round_up(h, 8))
    h_pad = _round_up(h, tile_h)

    xp = jnp.pad(xz, ((0, 0), (1, 1 + h_pad - h), (1, 1 + w_pad - w), (0, 0)))
    # pair adjacent padded columns into the lane dim: (.., W_pad+2, 3) -> (.., W_pad//2+1, 6)
    xp2 = xp.reshape(n, h_pad + 2, w_half + 1, 6)

    # --- weights: fold 1/std; (ky, kx, cin) x cout; block-diagonal over the even/odd output
    #     column pair so each result row carries 2*cout = 128 dense lanes.
    w_mat = jnp.transpose(conv_w * (1.0 / std).reshape(1, 3, 1, 1), (2, 3, 1, 0))
    w_mat = w_mat.reshape(9 * 3, cout)
    zeros = jnp.zeros_like(w_mat)
    w_blockdiag = jnp.concatenate(
        [jnp.concatenate([w_mat, zeros], axis=1),
         jnp.concatenate([zeros, w_mat], axis=1)], axis=0)          # (54, 2*cout)
    w_taps = w_blockdiag.reshape(18, 3, 2 * cout).astype(compute_dtype)

    scale2 = jnp.concatenate([bn_scale, bn_scale]).reshape(1, 2 * cout).astype(jnp.float32)
    shift2 = jnp.concatenate([bn_shift, bn_shift]).reshape(1, 2 * cout).astype(jnp.float32)

    m2 = tile_h * w_half
    grid = (n, h_pad // tile_h)
    kernel = functools.partial(_stem_conv_kernel, tile_h=tile_h, w_half=w_half,
                               compute_dtype=compute_dtype)

    out = pl.pallas_call(
        kernel,
        out_shape=jax.ShapeDtypeStruct((n, h_pad * w_half, 2 * cout), jnp.float32),
        grid_spec=pltpu.PrefetchScalarGridSpec(
            num_scalar_prefetch=0,
            grid=grid,
            in_specs=[
                # whole padded image stays VMEM-resident across the row-tile axis
                # (block index does not depend on t -> fetched once per image).
                pl.BlockSpec((1, h_pad + 2, w_half + 1, 6), lambda b, t: (b, 0, 0, 0)),
                pl.BlockSpec((18, 3, 2 * cout), lambda b, t: (0, 0, 0)),
                pl.BlockSpec((1, 2 * cout), lambda b, t: (0, 0)),
                pl.BlockSpec((1, 2 * cout), lambda b, t: (0, 0)),
            ],
            out_specs=pl.BlockSpec((1, m2, 2 * cout), lambda b, t: (b, t, 0)),
        ),
        compiler_params=pltpu.CompilerParams(
            dimension_semantics=("parallel", "parallel")),
        # TODO(synk): for full-resolution (800x1333) detection inputs, swap the VMEM-resident
        # image block for a (tile_h+2)-row halo block (manual DMA) and set vmem_limit_bytes.
    )(xp2, w_taps, scale2, shift2)

    # Free (metadata-only) unpack of the lane-paired layout back to NHWC, then crop padding.
    y = out.reshape(n, h_pad, w_pad, cout)
    return y[:, :h, :w, :]


# ---------------------------------------------------------------------------
# Pure-JAX reference (XLA, no Pallas) for a numerical sanity check.
# ---------------------------------------------------------------------------
def _reference_stem_nhwc(x_nhwc, conv_w, bn_scale, bn_shift,
                         mean=_IMAGENET_MEAN, std=_IMAGENET_STD):
    mean = jnp.asarray(mean, jnp.float32)
    std = jnp.asarray(std, jnp.float32)
    xn = (x_nhwc - mean) / std
    w_hwio = jnp.transpose(conv_w, (2, 3, 1, 0))
    y = jax.lax.conv_general_dilated(
        xn, w_hwio, window_strides=(1, 1), padding=((1, 1), (1, 1)),
        dimension_numbers=("NHWC", "HWIO", "NHWC"))
    y = y * bn_scale + bn_shift
    return jnp.maximum(y, 0.0)


# ---------------------------------------------------------------------------
# Module wrapper (the rewired ResNet stem of CoralMaskRCNN).
# ---------------------------------------------------------------------------
class CoralMaskRCNNStem:
    """Deterministic synthetic parameters matching the rewired stem:
       conv1: Conv2d(3, 64, kernel_size=3, stride=1, padding=1, bias=False)
       bn1  : FrozenBatchNorm2d(64)  (gamma=1, beta=0, mean=0, var=1)

    Layout: accepts and returns NHWC (channels-last) — the 64-channel output stays NHWC
    for downstream stages instead of transposing back to NCHW (the output transpose would
    move ~21x more HBM bytes than the 3-channel input).
    """

    def __init__(self, num_classes=40, key=jax.random.PRNGKey(0)):
        del num_classes  # detection heads are not reproduced (see TODO above)
        cout, cin, kk = 64, 3, 3
        self.conv1_w = (
            jax.random.normal(key, (cout, cin, kk, kk), dtype=jnp.float32) * 0.05
        )
        eps = 1e-5
        gamma = jnp.ones((cout,), jnp.float32)
        beta = jnp.zeros((cout,), jnp.float32)
        running_mean = jnp.zeros((cout,), jnp.float32)
        running_var = jnp.ones((cout,), jnp.float32)
        self.bn_scale = gamma / jnp.sqrt(running_var + eps)
        self.bn_shift = beta - running_mean * self.bn_scale

        self._fwd = jax.jit(
            lambda imgs: stem_conv3x3_bn_relu_nhwc(
                imgs, self.conv1_w, self.bn_scale, self.bn_shift))

    def forward(self, images_nhwc):
        # images_nhwc: [N, H, W, 3] float32 -> [N, H, W, 64] float32 (NHWC)
        return self._fwd(images_nhwc)

    def __call__(self, images_nhwc, targets=None):
        # TODO(synk): targets / training losses (RPN + RoI heads) not reproduced.
        return self.forward(images_nhwc)


if __name__ == "__main__":
    key = jax.random.PRNGKey(0)
    k_img, k_param = jax.random.split(key)
    images = jax.random.uniform(k_img, (2, 16, 16, 3), dtype=jnp.float32)  # NHWC, [0, 1]

    model = CoralMaskRCNNStem(num_classes=40, key=k_param)
    out = jax.block_until_ready(model(images))
    assert out.shape == (2, 16, 16, 64), out.shape

    ref = jax.block_until_ready(
        _reference_stem_nhwc(images, model.conv1_w, model.bn_scale, model.bn_shift))
    max_err = float(jnp.max(jnp.abs(out - ref)))
    # bf16 MXU operands with f32 accumulation / f32 epilogue -> small rounding error only.
    assert max_err < 1e-1, f"max abs error vs reference: {max_err}"

    print("KERNEL_OK")
</pallas_src>

<mosaic_0001>
module attributes {stable_mosaic.version = 11 : i64} {
  func.func @_stem_conv_kernel(%arg0: i32, %arg1: i32, %arg2: memref<1x18x9x6xf32, #tpu.memory_space<vmem>>, %arg3: memref<18x3x128xbf16, #tpu.memory_space<vmem>>, %arg4: memref<1x128xf32, #tpu.memory_space<vmem>>, %arg5: memref<1x128xf32, #tpu.memory_space<vmem>>, %arg6: memref<1x128x128xf32, #tpu.memory_space<vmem>>) attributes {dimension_semantics = [#tpu.dimension_semantics<parallel>, #tpu.dimension_semantics<parallel>], iteration_bounds = array<i64: 2, 1>, scalar_prefetch = 0 : i64, scratch_operands = 0 : i64, tpu.core_type = #tpu.core_type<tc>, window_params = [{transform_indices = @transform_0, window_bounds = array<i64: 1, 18, 9, 6>}, {pipeline_mode = #tpu.pipeline_mode<synchronous>, transform_indices = @transform_1, window_bounds = array<i64: 18, 3, 128>}, {pipeline_mode = #tpu.pipeline_mode<synchronous>, transform_indices = @transform_2, window_bounds = array<i64: 1, 128>}, {pipeline_mode = #tpu.pipeline_mode<synchronous>, transform_indices = @transform_3, window_bounds = array<i64: 1, 128>}, {transform_indices = @transform_4, window_bounds = array<i64: 1, 128, 128>}]} {
    %c16_i32 = arith.constant 16 : i32
    %0 = arith.muli %arg1, %c16_i32 : i32
    %1 = tpu.assume_multiple %0, 8 : i32
    %cst = arith.constant 0.000000e+00 : f32
    %2 = vector.broadcast %cst : f32 to vector<128x128xf32>
    %c0_i32 = arith.constant 0 : i32
    %3 = arith.addi %1, %c0_i32 : i32
    %c0 = arith.constant 0 : index
    %4 = arith.index_cast %3 : i32 to index
    %c0_0 = arith.constant 0 : index
    %c0_1 = arith.constant 0 : index
    %5 = vector.load %arg2[%c0, %4, %c0_0, %c0_1] : memref<1x18x9x6xf32, #tpu.memory_space<vmem>>, vector<1x16x8x3xf32>
    %6 = vector.shape_cast %5 : vector<1x16x8x3xf32> to vector<16x8x3xf32>
    %7 = vector.shape_cast %6 : vector<16x8x3xf32> to vector<128x3xf32>
    %8 = arith.truncf %7 : vector<128x3xf32> to vector<128x3xbf16>
    %c0_2 = arith.constant 0 : index
    %c0_3 = arith.constant 0 : index
    %c0_4 = arith.constant 0 : index
    %9 = vector.load %arg3[%c0_2, %c0_3, %c0_4] : memref<18x3x128xbf16, #tpu.memory_space<vmem>>, vector<1x3x128xbf16>
    %10 = vector.shape_cast %9 : vector<1x3x128xbf16> to vector<3x128xbf16>
    %cst_5 = arith.constant dense<0.000000e+00> : vector<128x128xf32>
    %11 = tpu.matmul %8, %10, %cst_5 {dimension_numbers = #tpu.dot_dimension_numbers<[1], [0], [0], [1], [0, 0, 1, 1], [], []>} : vector<128x3xbf16>, vector<3x128xbf16>, vector<128x128xf32> -> vector<128x128xf32>
    %12 = arith.addf %2, %11 : vector<128x128xf32>
    %c0_i32_6 = arith.constant 0 : i32
    %13 = arith.addi %1, %c0_i32_6 : i32
    %c0_7 = arith.constant 0 : index
    %14 = arith.index_cast %13 : i32 to index
    %c0_8 = arith.constant 0 : index
    %c3 = arith.constant 3 : index
    %15 = vector.load %arg2[%c0_7, %14, %c0_8, %c3] : memref<1x18x9x6xf32, #tpu.memory_space<vmem>>, vector<1x16x8x3xf32>
    %16 = vector.shape_cast %15 : vector<1x16x8x3xf32> to vector<16x8x3xf32>
    %17 = vector.shape_cast %16 : vector<16x8x3xf32> to vector<128x3xf32>
    %18 = arith.truncf %17 : vector<128x3xf32> to vector<128x3xbf16>
    %c1 = arith.constant 1 : index
    %c0_9 = arith.constant 0 : index
    %c0_10 = arith.constant 0 : index
    %19 = vector.load %arg3[%c1, %c0_9, %c0_10] : memref<18x3x128xbf16, #tpu.memory_space<vmem>>, vector<1x3x128xbf16>
    %20 = vector.shape_cast %19 : vector<1x3x128xbf16> to vector<3x128xbf16>
    %cst_11 = arith.constant dense<0.000000e+00> : vector<128x128xf32>
    %21 = tpu.matmul %18, %20, %cst_11 {dimension_numbers = #tpu.dot_dimension_numbers<[1], [0], [0], [1], [0, 0, 1, 1], [], []>} : vector<128x3xbf16>, vector<3x128xbf16>, vector<128x128xf32> -> vector<128x128xf32>
    %22 = arith.addf %12, %21 : vector<128x128xf32>
    %c0_i32_12 = arith.constant 0 : i32
    %23 = arith.addi %1, %c0_i32_12 : i32
    %c0_13 = arith.constant 0 : index
    %24 = arith.index_cast %23 : i32 to index
    %c1_14 = arith.constant 1 : index
    %c0_15 = arith.constant 0 : index
    %25 = vector.load %arg2[%c0_13, %24, %c1_14, %c0_15] : memref<1x18x9x6xf32, #tpu.memory_space<vmem>>, vector<1x16x8x3xf32>
    %26 = vector.shape_cast %25 : vector<1x16x8x3xf32> to vector<16x8x3xf32>
    %27 = vector.shape_cast %26 : vector<16x8x3xf32> to vector<128x3xf32>
    %28 = arith.truncf %27 : vector<128x3xf32> to vector<128x3xbf16>
    %c2 = arith.constant 2 : index
    %c0_16 = arith.constant 0 : index
    %c0_17 = arith.constant 0 : index
    %29 = vector.load %arg3[%c2, %c0_16, %c0_17] : memref<18x3x128xbf16, #tpu.memory_space<vmem>>, vector<1x3x128xbf16>
    %30 = vector.shape_cast %29 : vector<1x3x128xbf16> to vector<3x128xbf16>
    %cst_18 = arith.constant dense<0.000000e+00> : vector<128x128xf32>
    %31 = tpu.matmul %28, %30, %cst_18 {dimension_numbers = #tpu.dot_dimension_numbers<[1], [0], [0], [1], [0, 0, 1, 1], [], []>} : vector<128x3xbf16>, vector<3x128xbf16>, vector<128x128xf32> -> vector<128x128xf32>
    %32 = arith.addf %22, %31 : vector<128x128xf32>
    %c1_i32 = arith.constant 1 : i32
    %33 = arith.addi %1, %c1_i32 : i32
    %c0_19 = arith.constant 0 : index
    %34 = arith.index_cast %33 : i32 to index
    %c0_20 = arith.constant 0 : index
    %c0_21 = arith.constant 0 : index
    %35 = vector.load %arg2[%c0_19, %34, %c0_20, %c0_21] : memref<1x18x9x6xf32, #tpu.memory_space<vmem>>, vector<1x16x8x3xf32>
    %36 = vector.shape_cast %35 : vector<1x16x8x3xf32> to vector<16x8x3xf32>
    %37 = vector.shape_cast %36 : vector<16x8x3xf32> to vector<128x3xf32>
    %38 = arith.truncf %37 : vector<128x3xf32> to vector<128x3xbf16>
    %c3_22 = arith.constant 3 : index
    %c0_23 = arith.constant 0 : index
    %c0_24 = arith.constant 0 : index
    %39 = vector.load %arg3[%c3_22, %c0_23, %c0_24] : memref<18x3x128xbf16, #tpu.memory_space<vmem>>, vector<1x3x128xbf16>
    %40 = vector.shape_cast %39 : vector<1x3x128xbf16> to vector<3x128xbf16>
    %cst_25 = arith.constant dense<0.000000e+00> : vector<128x128xf32>
    %41 = tpu.matmul %38, %40, %cst_25 {dimension_numbers = #tpu.dot_dimension_numbers<[1], [0], [0], [1], [0, 0, 1, 1], [], []>} : vector<128x3xbf16>, vector<3x128xbf16>, vector<128x128xf32> -> vector<128x128xf32>
    %42 = arith.addf %32, %41 : vector<128x128xf32>
    %c1_i32_26 = arith.constant 1 : i32
    %43 = arith.addi %1, %c1_i32_26 : i32
    %c0_27 = arith.constant 0 : index
    %44 = arith.index_cast %43 : i32 to index
    %c0_28 = arith.constant 0 : index
    %c3_29 = arith.constant 3 : index
    %45 = vector.load %arg2[%c0_27, %44, %c0_28, %c3_29] : memref<1x18x9x6xf32, #tpu.memory_space<vmem>>, vector<1x16x8x3xf32>
    %46 = vector.shape_cast %45 : vector<1x16x8x3xf32> to vector<16x8x3xf32>
    %47 = vector.shape_cast %46 : vector<16x8x3xf32> to vector<128x3xf32>
    %48 = arith.truncf %47 : vector<128x3xf32> to vector<128x3xbf16>
    %c4 = arith.constant 4 : index
    %c0_30 = arith.constant 0 : index
    %c0_31 = arith.constant 0 : index
    %49 = vector.load %arg3[%c4, %c0_30, %c0_31] : memref<18x3x128xbf16, #tpu.memory_space<vmem>>, vector<1x3x128xbf16>
    %50 = vector.shape_cast %49 : vector<1x3x128xbf16> to vector<3x128xbf16>
    %cst_32 = arith.constant dense<0.000000e+00> : vector<128x128xf32>
    %51 = tpu.matmul %48, %50, %cst_32 {dimension_numbers = #tpu.dot_dimension_numbers<[1], [0], [0], [1], [0, 0, 1, 1], [], []>} : vector<128x3xbf16>, vector<3x128xbf16>, vector<128x128xf32> -> vector<128x128xf32>
    %52 = arith.addf %42, %51 : vector<128x128xf32>
    %c1_i32_33 = arith.constant 1 : i32
    %53 = arith.addi %1, %c1_i32_33 : i32
    %c0_34 = arith.constant 0 : index
    %54 = arith.index_cast %53 : i32 to index
    %c1_35 = arith.constant 1 : index
    %c0_36 = arith.constant 0 : index
    %55 = vector.load %arg2[%c0_34, %54, %c1_35, %c0_36] : memref<1x18x9x6xf32, #tpu.memory_space<vmem>>, vector<1x16x8x3xf32>
    %56 = vector.shape_cast %55 : vector<1x16x8x3xf32> to vector<16x8x3xf32>
    %57 = vector.shape_cast %56 : vector<16x8x3xf32> to vector<128x3xf32>
    %58 = arith.truncf %57 : vector<128x3xf32> to vector<128x3xbf16>
    %c5 = arith.constant 5 : index
    %c0_37 = arith.constant 0 : index
    %c0_38 = arith.constant 0 : index
    %59 = vector.load %arg3[%c5, %c0_37, %c0_38] : memref<18x3x128xbf16, #tpu.memory_space<vmem>>, vector<1x3x128xbf16>
    %60 = vector.shape_cast %59 : vector<1x3x128xbf16> to vector<3x128xbf16>
    %cst_39 = arith.constant dense<0.000000e+00> : vector<128x128xf32>
    %61 = tpu.matmul %58, %60, %cst_39 {dimension_numbers = #tpu.dot_dimension_numbers<[1], [0], [0], [1], [0, 0, 1, 1], [], []>} : vector<128x3xbf16>, vector<3x128xbf16>, vector<128x128xf32> -> vector<128x128xf32>
    %62 = arith.addf %52, %61 : vector<128x128xf32>
    %c2_i32 = arith.constant 2 : i32
    %63 = arith.addi %1, %c2_i32 : i32
    %c0_40 = arith.constant 0 : index
    %64 = arith.index_cast %63 : i32 to index
    %c0_41 = arith.constant 0 : index
    %c0_42 = arith.constant 0 : index
    %65 = vector.load %arg2[%c0_40, %64, %c0_41, %c0_42] : memref<1x18x9x6xf32, #tpu.memory_space<vmem>>, vector<1x16x8x3xf32>
    %66 = vector.shape_cast %65 : vector<1x16x8x3xf32> to vector<16x8x3xf32>
    %67 = vector.shape_cast %66 : vector<16x8x3xf32> to vector<128x3xf32>
    %68 = arith.truncf %67 : vector<128x3xf32> to vector<128x3xbf16>
    %c6 = arith.constant 6 : index
    %c0_43 = arith.constant 0 : index
    %c0_44 = arith.constant 0 : index
    %69 = vector.load %arg3[%c6, %c0_43, %c0_44] : memref<18x3x128xbf16, #tpu.memory_space<vmem>>, vector<1x3x128xbf16>
    %70 = vector.shape_cast %69 : vector<1x3x128xbf16> to vector<3x128xbf16>
    %cst_45 = arith.constant dense<0.000000e+00> : vector<128x128xf32>
    %71 = tpu.matmul %68, %70, %cst_45 {dimension_numbers = #tpu.dot_dimension_numbers<[1], [0], [0], [1], [0, 0, 1, 1], [], []>} : vector<128x3xbf16>, vector<3x128xbf16>, vector<128x128xf32> -> vector<128x128xf32>
    %72 = arith.addf %62, %71 : vector<128x128xf32>
    %c2_i32_46 = arith.constant 2 : i32
    %73 = arith.addi %1, %c2_i32_46 : i32
    %c0_47 = arith.constant 0 : index
    %74 = arith.index_cast %73 : i32 to index
    %c0_48 = arith.constant 0 : index
    %c3_49 = arith.constant 3 : index
    %75 = vector.load %arg2[%c0_47, %74, %c0_48, %c3_49] : memref<1x18x9x6xf32, #tpu.memory_space<vmem>>, vector<1x16x8x3xf32>
    %76 = vector.shape_cast %75 : vector<1x16x8x3xf32> to vector<16x8x3xf32>
    %77 = vector.shape_cast %76 : vector<16x8x3xf32> to vector<128x3xf32>
    %78 = arith.truncf %77 : vector<128x3xf32> to vector<128x3xbf16>
    %c7 = arith.constant 7 : index
    %c0_50 = arith.constant 0 : index
    %c0_51 = arith.constant 0 : index
    %79 = vector.load %arg3[%c7, %c0_50, %c0_51] : memref<18x3x128xbf16, #tpu.memory_space<vmem>>, vector<1x3x128xbf16>
    %80 = vector.shape_cast %79 : vector<1x3x128xbf16> to vector<3x128xbf16>
    %cst_52 = arith.constant dense<0.000000e+00> : vector<128x128xf32>
    %81 = tpu.matmul %78, %80, %cst_52 {dimension_numbers = #tpu.dot_dimension_numbers<[1], [0], [0], [1], [0, 0, 1, 1], [], []>} : vector<128x3xbf16>, vector<3x128xbf16>, vector<128x128xf32> -> vector<128x128xf32>
    %82 = arith.addf %72, %81 : vector<128x128xf32>
    %c2_i32_53 = arith.constant 2 : i32
    %83 = arith.addi %1, %c2_i32_53 : i32
    %c0_54 = arith.constant 0 : index
    %84 = arith.index_cast %83 : i32 to index
    %c1_55 = arith.constant 1 : index
    %c0_56 = arith.constant 0 : index
    %85 = vector.load %arg2[%c0_54, %84, %c1_55, %c0_56] : memref<1x18x9x6xf32, #tpu.memory_space<vmem>>, vector<1x16x8x3xf32>
    %86 = vector.shape_cast %85 : vector<1x16x8x3xf32> to vector<16x8x3xf32>
    %87 = vector.shape_cast %86 : vector<16x8x3xf32> to vector<128x3xf32>
    %88 = arith.truncf %87 : vector<128x3xf32> to vector<128x3xbf16>
    %c8 = arith.constant 8 : index
    %c0_57 = arith.constant 0 : index
    %c0_58 = arith.constant 0 : index
    %89 = vector.load %arg3[%c8, %c0_57, %c0_58] : memref<18x3x128xbf16, #tpu.memory_space<vmem>>, vector<1x3x128xbf16>
    %90 = vector.shape_cast %89 : vector<1x3x128xbf16> to vector<3x128xbf16>
    %cst_59 = arith.constant dense<0.000000e+00> : vector<128x128xf32>
    %91 = tpu.matmul %88, %90, %cst_59 {dimension_numbers = #tpu.dot_dimension_numbers<[1], [0], [0], [1], [0, 0, 1, 1], [], []>} : vector<128x3xbf16>, vector<3x128xbf16>, vector<128x128xf32> -> vector<128x128xf32>
    %92 = arith.addf %82, %91 : vector<128x128xf32>
    %c0_i32_60 = arith.constant 0 : i32
    %93 = arith.addi %1, %c0_i32_60 : i32
    %c0_61 = arith.constant 0 : index
    %94 = arith.index_cast %93 : i32 to index
    %c0_62 = arith.constant 0 : index
    %c3_63 = arith.constant 3 : index
    %95 = vector.load %arg2[%c0_61, %94, %c0_62, %c3_63] : memref<1x18x9x6xf32, #tpu.memory_space<vmem>>, vector<1x16x8x3xf32>
    %96 = vector.shape_cast %95 : vector<1x16x8x3xf32> to vector<16x8x3xf32>
    %97 = vector.shape_cast %96 : vector<16x8x3xf32> to vector<128x3xf32>
    %98 = arith.truncf %97 : vector<128x3xf32> to vector<128x3xbf16>
    %c9 = arith.constant 9 : index
    %c0_64 = arith.constant 0 : index
    %c0_65 = arith.constant 0 : index
    %99 = vector.load %arg3[%c9, %c0_64, %c0_65] : memref<18x3x128xbf16, #tpu.memory_space<vmem>>, vector<1x3x128xbf16>
    %100 = vector.shape_cast %99 : vector<1x3x128xbf16> to vector<3x128xbf16>
    %cst_66 = arith.constant dense<0.000000e+00> : vector<128x128xf32>
    %101 = tpu.matmul %98, %100, %cst_66 {dimension_numbers = #tpu.dot_dimension_numbers<[1], [0], [0], [1], [0, 0, 1, 1], [], []>} : vector<128x3xbf16>, vector<3x128xbf16>, vector<128x128xf32> -> vector<128x128xf32>
    %102 = arith.addf %92, %101 : vector<128x128xf32>
    %c0_i32_67 = arith.constant 0 : i32
    %103 = arith.addi %1, %c0_i32_67 : i32
    %c0_68 = arith.constant 0 : index
    %104 = arith.index_cast %103 : i32 to index
    %c1_69 = arith.constant 1 : index
    %c0_70 = arith.constant 0 : index
    %105 = vector.load %arg2[%c0_68, %104, %c1_69, %c0_70] : memref<1x18x9x6xf32, #tpu.memory_space<vmem>>, vector<1x16x8x3xf32>
    %106 = vector.shape_cast %105 : vector<1x16x8x3xf32> to vector<16x8x3xf32>
    %107 = vector.shape_cast %106 : vector<16x8x3xf32> to vector<128x3xf32>
    %108 = arith.truncf %107 : vector<128x3xf32> to vector<128x3xbf16>
    %c10 = arith.constant 10 : index
    %c0_71 = arith.constant 0 : index
    %c0_72 = arith.constant 0 : index
    %109 = vector.load %arg3[%c10, %c0_71, %c0_72] : memref<18x3x128xbf16, #tpu.memory_space<vmem>>, vector<1x3x128xbf16>
    %110 = vector.shape_cast %109 : vector<1x3x128xbf16> to vector<3x128xbf16>
    %cst_73 = arith.constant dense<0.000000e+00> : vector<128x128xf32>
    %111 = tpu.matmul %108, %110, %cst_73 {dimension_numbers = #tpu.dot_dimension_numbers<[1], [0], [0], [1], [0, 0, 1, 1], [], []>} : vector<128x3xbf16>, vector<3x128xbf16>, vector<128x128xf32> -> vector<128x128xf32>
    %112 = arith.addf %102, %111 : vector<128x128xf32>
    %c0_i32_74 = arith.constant 0 : i32
    %113 = arith.addi %1, %c0_i32_74 : i32
    %c0_75 = arith.constant 0 : index
    %114 = arith.index_cast %113 : i32 to index
    %c1_76 = arith.constant 1 : index
    %c3_77 = arith.constant 3 : index
    %115 = vector.load %arg2[%c0_75, %114, %c1_76, %c3_77] : memref<1x18x9x6xf32, #tpu.memory_space<vmem>>, vector<1x16x8x3xf32>
    %116 = vector.shape_cast %115 : vector<1x16x8x3xf32> to vector<16x8x3xf32>
    %117 = vector.shape_cast %116 : vector<16x8x3xf32> to vector<128x3xf32>
    %118 = arith.truncf %117 : vector<128x3xf32> to vector<128x3xbf16>
    %c11 = arith.constant 11 : index
    %c0_78 = arith.constant 0 : index
    %c0_79 = arith.constant 0 : index
    %119 = vector.load %arg3[%c11, %c0_78, %c0_79] : memref<18x3x128xbf16, #tpu.memory_space<vmem>>, vector<1x3x128xbf16>
    %120 = vector.shape_cast %119 : vector<1x3x128xbf16> to vector<3x128xbf16>
    %cst_80 = arith.constant dense<0.000000e+00> : vector<128x128xf32>
    %121 = tpu.matmul %118, %120, %cst_80 {dimension_numbers = #tpu.dot_dimension_numbers<[1], [0], [0], [1], [0, 0, 1, 1], [], []>} : vector<128x3xbf16>, vector<3x128xbf16>, vector<128x128xf32> -> vector<128x128xf32>
    %122 = arith.addf %112, %121 : vector<128x128xf32>
    %c1_i32_81 = arith.constant 1 : i32
    %123 = arith.addi %1, %c1_i32_81 : i32
    %c0_82 = arith.constant 0 : index
    %124 = arith.index_cast %123 : i32 to index
    %c0_83 = arith.constant 0 : index
    %c3_84 = arith.constant 3 : index
    %125 = vector.load %arg2[%c0_82, %124, %c0_83, %c3_84] : memref<1x18x9x6xf32, #tpu.memory_space<vmem>>, vector<1x16x8x3xf32>
    %126 = vector.shape_cast %125 : vector<1x16x8x3xf32> to vector<16x8x3xf32>
    %127 = vector.shape_cast %126 : vector<16x8x3xf32> to vector<128x3xf32>
    %128 = arith.truncf %127 : vector<128x3xf32> to vector<128x3xbf16>
    %c12 = arith.constant 12 : index
    %c0_85 = arith.constant 0 : index
    %c0_86 = arith.constant 0 : index
    %129 = vector.load %arg3[%c12, %c0_85, %c0_86] : memref<18x3x128xbf16, #tpu.memory_space<vmem>>, vector<1x3x128xbf16>
    %130 = vector.shape_cast %129 : vector<1x3x128xbf16> to vector<3x128xbf16>
    %cst_87 = arith.constant dense<0.000000e+00> : vector<128x128xf32>
    %131 = tpu.matmul %128, %130, %cst_87 {dimension_numbers = #tpu.dot_dimension_numbers<[1], [0], [0], [1], [0, 0, 1, 1], [], []>} : vector<128x3xbf16>, vector<3x128xbf16>, vector<128x128xf32> -> vector<128x128xf32>
    %132 = arith.addf %122, %131 : vector<128x128xf32>
    %c1_i32_88 = arith.constant 1 : i32
    %133 = arith.addi %1, %c1_i32_88 : i32
    %c0_89 = arith.constant 0 : index
    %134 = arith.index_cast %133 : i32 to index
    %c1_90 = arith.constant 1 : index
    %c0_91 = arith.constant 0 : index
    %135 = vector.load %arg2[%c0_89, %134, %c1_90, %c0_91] : memref<1x18x9x6xf32, #tpu.memory_space<vmem>>, vector<1x16x8x3xf32>
    %136 = vector.shape_cast %135 : vector<1x16x8x3xf32> to vector<16x8x3xf32>
    %137 = vector.shape_cast %136 : vector<16x8x3xf32> to vector<128x3xf32>
    %138 = arith.truncf %137 : vector<128x3xf32> to vector<128x3xbf16>
    %c13 = arith.constant 13 : index
    %c0_92 = arith.constant 0 : index
    %c0_93 = arith.constant 0 : index
    %139 = vector.load %arg3[%c13, %c0_92, %c0_93] : memref<18x3x128xbf16, #tpu.memory_space<vmem>>, vector<1x3x128xbf16>
    %140 = vector.shape_cast %139 : vector<1x3x128xbf16> to vector<3x128xbf16>
    %cst_94 = arith.constant dense<0.000000e+00> : vector<128x128xf32>
    %141 = tpu.matmul %138, %140, %cst_94 {dimension_numbers = #tpu.dot_dimension_numbers<[1], [0], [0], [1], [0, 0, 1, 1], [], []>} : vector<128x3xbf16>, vector<3x128xbf16>, vector<128x128xf32> -> vector<128x128xf32>
    %142 = arith.addf %132, %141 : vector<128x128xf32>
    %c1_i32_95 = arith.constant 1 : i32
    %143 = arith.addi %1, %c1_i32_95 : i32
    %c0_96 = arith.constant 0 : index
    %144 = arith.index_cast %143 : i32 to index
    %c1_97 = arith.constant 1 : index
    %c3_98 = arith.constant 3 : index
    %145 = vector.load %arg2[%c0_96, %144, %c1_97, %c3_98] : memref<1x18x9x6xf32, #tpu.memory_space<vmem>>, vector<1x16x8x3xf32>
    %146 = vector.shape_cast %145 : vector<1x16x8x3xf32> to vector<16x8x3xf32>
    %147 = vector.shape_cast %146 : vector<16x8x3xf32> to vector<128x3xf32>
    %148 = arith.truncf %147 : vector<128x3xf32> to vector<128x3xbf16>
    %c14 = arith.constant 14 : index
    %c0_99 = arith.constant 0 : index
    %c0_100 = arith.constant 0 : index
    %149 = vector.load %arg3[%c14, %c0_99, %c0_100] : memref<18x3x128xbf16, #tpu.memory_space<vmem>>, vector<1x3x128xbf16>
    %150 = vector.shape_cast %149 : vector<1x3x128xbf16> to vector<3x128xbf16>
    %cst_101 = arith.constant dense<0.000000e+00> : vector<128x128xf32>
    %151 = tpu.matmul %148, %150, %cst_101 {dimension_numbers = #tpu.dot_dimension_numbers<[1], [0], [0], [1], [0, 0, 1, 1], [], []>} : vector<128x3xbf16>, vector<3x128xbf16>, vector<128x128xf32> -> vector<128x128xf32>
    %152 = arith.addf %142, %151 : vector<128x128xf32>
    %c2_i32_102 = arith.constant 2 : i32
    %153 = arith.addi %1, %c2_i32_102 : i32
    %c0_103 = arith.constant 0 : index
    %154 = arith.index_cast %153 : i32 to index
    %c0_104 = arith.constant 0 : index
    %c3_105 = arith.constant 3 : index
    %155 = vector.load %arg2[%c0_103, %154, %c0_104, %c3_105] : memref<1x18x9x6xf32, #tpu.memory_space<vmem>>, vector<1x16x8x3xf32>
    %156 = vector.shape_cast %155 : vector<1x16x8x3xf32> to vector<16x8x3xf32>
    %157 = vector.shape_cast %156 : vector<16x8x3xf32> to vector<128x3xf32>
    %158 = arith.truncf %157 : vector<128x3xf32> to vector<128x3xbf16>
    %c15 = arith.constant 15 : index
    %c0_106 = arith.constant 0 : index
    %c0_107 = arith.constant 0 : index
    %159 = vector.load %arg3[%c15, %c0_106, %c0_107] : memref<18x3x128xbf16, #tpu.memory_space<vmem>>, vector<1x3x128xbf16>
    %160 = vector.shape_cast %159 : vector<1x3x128xbf16> to vector<3x128xbf16>
    %cst_108 = arith.constant dense<0.000000e+00> : vector<128x128xf32>
    %161 = tpu.matmul %158, %160, %cst_108 {dimension_numbers = #tpu.dot_dimension_numbers<[1], [0], [0], [1], [0, 0, 1, 1], [], []>} : vector<128x3xbf16>, vector<3x128xbf16>, vector<128x128xf32> -> vector<128x128xf32>
    %162 = arith.addf %152, %161 : vector<128x128xf32>
    %c2_i32_109 = arith.constant 2 : i32
    %163 = arith.addi %1, %c2_i32_109 : i32
    %c0_110 = arith.constant 0 : index
    %164 = arith.index_cast %163 : i32 to index
    %c1_111 = arith.constant 1 : index
    %c0_112 = arith.constant 0 : index
    %165 = vector.load %arg2[%c0_110, %164, %c1_111, %c0_112] : memref<1x18x9x6xf32, #tpu.memory_space<vmem>>, vector<1x16x8x3xf32>
    %166 = vector.shape_cast %165 : vector<1x16x8x3xf32> to vector<16x8x3xf32>
    %167 = vector.shape_cast %166 : vector<16x8x3xf32> to vector<128x3xf32>
    %168 = arith.truncf %167 : vector<128x3xf32> to vector<128x3xbf16>
    %c16 = arith.constant 16 : index
    %c0_113 = arith.constant 0 : index
    %c0_114 = arith.constant 0 : index
    %169 = vector.load %arg3[%c16, %c0_113, %c0_114] : memref<18x3x128xbf16, #tpu.memory_space<vmem>>, vector<1x3x128xbf16>
    %170 = vector.shape_cast %169 : vector<1x3x128xbf16> to vector<3x128xbf16>
    %cst_115 = arith.constant dense<0.000000e+00> : vector<128x128xf32>
    %171 = tpu.matmul %168, %170, %cst_115 {dimension_numbers = #tpu.dot_dimension_numbers<[1], [0], [0], [1], [0, 0, 1, 1], [], []>} : vector<128x3xbf16>, vector<3x128xbf16>, vector<128x128xf32> -> vector<128x128xf32>
    %172 = arith.addf %162, %171 : vector<128x128xf32>
    %c2_i32_116 = arith.constant 2 : i32
    %173 = arith.addi %1, %c2_i32_116 : i32
    %c0_117 = arith.constant 0 : index
    %174 = arith.index_cast %173 : i32 to index
    %c1_118 = arith.constant 1 : index
    %c3_119 = arith.constant 3 : index
    %175 = vector.load %arg2[%c0_117, %174, %c1_118, %c3_119] : memref<1x18x9x6xf32, #tpu.memory_space<vmem>>, vector<1x16x8x3xf32>
    %176 = vector.shape_cast %175 : vector<1x16x8x3xf32> to vector<16x8x3xf32>
    %177 = vector.shape_cast %176 : vector<16x8x3xf32> to vector<128x3xf32>
    %178 = arith.truncf %177 : vector<128x3xf32> to vector<128x3xbf16>
    %c17 = arith.constant 17 : index
    %c0_120 = arith.constant 0 : index
    %c0_121 = arith.constant 0 : index
    %179 = vector.load %arg3[%c17, %c0_120, %c0_121] : memref<18x3x128xbf16, #tpu.memory_space<vmem>>, vector<1x3x128xbf16>
    %180 = vector.shape_cast %179 : vector<1x3x128xbf16> to vector<3x128xbf16>
    %cst_122 = arith.constant dense<0.000000e+00> : vector<128x128xf32>
    %181 = tpu.matmul %178, %180, %cst_122 {dimension_numbers = #tpu.dot_dimension_numbers<[1], [0], [0], [1], [0, 0, 1, 1], [], []>} : vector<128x3xbf16>, vector<3x128xbf16>, vector<128x128xf32> -> vector<128x128xf32>
    %182 = arith.addf %172, %181 : vector<128x128xf32>
    %c0_123 = arith.constant 0 : index
    %c0_124 = arith.constant 0 : index
    %183 = vector.load %arg4[%c0_123, %c0_124] : memref<1x128xf32, #tpu.memory_space<vmem>>, vector<1x128xf32>
    %184 = vector.broadcast %183 : vector<1x128xf32> to vector<128x128xf32>
    %185 = arith.mulf %182, %184 : vector<128x128xf32>
    %c0_125 = arith.constant 0 : index
    %c0_126 = arith.constant 0 : index
    %186 = vector.load %arg5[%c0_125, %c0_126] : memref<1x128xf32, #tpu.memory_space<vmem>>, vector<1x128xf32>
    %187 = vector.broadcast %186 : vector<1x128xf32> to vector<128x128xf32>
    %188 = arith.addf %185, %187 : vector<128x128xf32>
    %cst_127 = arith.constant 0.000000e+00 : f32
    %189 = vector.broadcast %cst_127 : f32 to vector<128x128xf32>
    %190 = arith.maximumf %188, %189 : vector<128x128xf32>
    %c0_128 = arith.constant 0 : index
    %c0_129 = arith.constant 0 : index
    %c0_130 = arith.constant 0 : index
    %191 = vector.load %arg6[%c0_128, %c0_129, %c0_130] : memref<1x128x128xf32, #tpu.memory_space<vmem>>, vector<1x128x128xf32>
    %192 = vector.shape_cast %191 : vector<1x128x128xf32> to vector<128x128xf32>
    %193 = vector.shape_cast %190 : vector<128x128xf32> to vector<1x128x128xf32>
    tpu.vector_store %arg6[%c0_128, %c0_129, %c0_130], %193 {strides = array<i32>} : memref<1x128x128xf32, #tpu.memory_space<vmem>>, vector<1x128x128xf32>,
    return
  }
  func.func @transform_0(%arg0: i32, %arg1: i32) -> (i32, i32, i32, i32) {
    %c0_i32 = arith.constant 0 : i32
    %c0_i32_0 = arith.constant 0 : i32
    %c0_i32_1 = arith.constant 0 : i32
    %c0_i32_2 = arith.constant 0 : i32
    return %arg0, %c0_i32, %c0_i32_0, %c0_i32_1 : i32, i32, i32, i32
  }
  func.func @transform_1(%arg0: i32, %arg1: i32) -> (i32, i32, i32) {
    %c0_i32 = arith.constant 0 : i32
    %c0_i32_0 = arith.constant 0 : i32
    %c0_i32_1 = arith.constant 0 : i32
    %c0_i32_2 = arith.constant 0 : i32
    return %c0_i32, %c0_i32_0, %c0_i32_1 : i32, i32, i32
  }
  func.func @transform_2(%arg0: i32, %arg1: i32) -> (i32, i32) {
    %c0_i32 = arith.constant 0 : i32
    %c0_i32_0 = arith.constant 0 : i32
    %c0_i32_1 = arith.constant 0 : i32
    return %c0_i32, %c0_i32_0 : i32, i32
  }
  func.func @transform_3(%arg0: i32, %arg1: i32) -> (i32, i32) {
    %c0_i32 = arith.constant 0 : i32
    %c0_i32_0 = arith.constant 0 : i32
    %c0_i32_1 = arith.constant 0 : i32
    return %c0_i32, %c0_i32_0 : i32, i32
  }
  func.func @transform_4(%arg0: i32, %arg1: i32) -> (i32, i32, i32) {
    %c0_i32 = arith.constant 0 : i32
    %c0_i32_0 = arith.constant 0 : i32
    return %arg0, %arg1, %c0_i32 : i32, i32, i32
  }
}

</mosaic_0001>

<bundles_post_ra>
// kernel: _lambda_.1
= control target key start
LH: loop header
LB: loop body
LE: loop exit
PB: predicated region body
PF: predicated region fallthrough
CT: control target
= control target key end

     0   :  { %s2520_s15 = smov 0   ;;  %s2522_s16 = smov 0   ;;  %s3712_s0 = inlined_call_operand.vmem [shape: f32[2,18,9,6], index: 0, kind: input, shape index: {}]   ;;  %s3713_s1 = inlined_call_operand.vmem [shape: bf16[18,3,128], index: 1, kind: input, shape index: {}]   ;;  %s3714_s2 = inlined_call_operand.vmem [shape: f32[1,128], index: 2, kind: input, shape index: {}]   ;;  %s3715_s3 = inlined_call_operand.vmem [shape: f32[1,128], index: 3, kind: input, shape index: {}]   ;;  %s3716_s4 = inlined_call_operand.vmem [shape: f32[2,128,128], index: 4, kind: output, shape index: {}]  }
   0x1   :  { %s2524_s17 = smov 0  }
   0x2 LB: > { %s26_s18 = sadd.s32 1, %s2487_s16  ;;  %p2206_p0 = scmp.ge.s32.totalorder %s2491_s17, 1  ;;  %s2491_s17 = sphi %s2524_s17, %s14_s17   ;;  %s2487_s16 = sphi %s2522_s16, %s3841_s16   ;;  %s2483_s15 = sphi %s2520_s15, %s3840_s15  }
   0x3   : > { %p28_p1 = scmp.ge.s32.totalorder %s26_s18, 2  ;;  %p176_p2 = scmp.lt.s32.totalorder %s2491_s17, 3 }
   0x5   : > { %s3843_s18 = smov (%p28_p1, %s26_s18), 0  ;;  %p177_p3 = pnand %p2206_p0, %p176_p2 }
   0x7   : > { %180 = sbr.rel (%p177_p3) target bundleno = 851 (0x353), region = 36 }
   0xc   : > { %v249_v0 = vld [vmem:[%s3713_s1] sm:$0x3]  ;;  %vm301_vm0 = vcmask 1040384   ;;  %vm302_vm1 = vcmask 1041408   ;;  %p206_p4 = scmp.lt.s32.totalorder %s2483_s15, 1  ;;  %v2493_v1 = vmov 65535  }
   0xd   : > { %v303_v2 = vsel %vm301_vm0, 4294967295, %v2493_v1  ;;  %vm276_vm2 = vcmask 23552   ;;  %s2494_s25 = smov 125   ;;  %v2252_v29 = vld [vmem:[%s3713_s1 + $0x6] sm:$0x3] }
   0xe   : > { %v2541_v3 = vsel %vm302_vm1, %v303_v2, 0  ;;  %s3845_s15 = smov (!%p206_p4, %s2483_s15), 1  ;;  %v2286_v30 = vld [vmem:[%s3713_s1 + $0xa] sm:$0x3]  ;;  %v2210_v43 = vld [vmem:[%s3713_s1 + $0x2] sm:$0x3] }
   0xf   : > { %v382_v4 = vand.u32 %v2541_v3, %v249_v0  ;;  %s2440_s21 = smul.u32 288, %s3845_s15  ;;  %v605_v32 = vand.u32 %v2252_v29, %v2541_v3  ;;  %v841_v33 = vand.u32 %v2286_v30, %v2541_v3  ;;  %v306_v45 = vand.u32 %v2210_v43, %v2541_v3  ;;  %v2227_v50 = vld [vmem:[%s3713_s1 + $0x4] sm:$0x3]  ;;  %v2261_v54 = vld [vmem:[%s3713_s1 + $0x8] sm:$0x3]  ;;  %s2437_s20 = sshll.u32 %s3845_s15, 7 }
  0x10   : > { %v484_v51 = vand.u32 %v2227_v50, %v2541_v3  ;;  %v723_v55 = vand.u32 %v2261_v54, %v2541_v3  ;;  %s3641_s23 = scalar_lea.vmem %s3716_s4, %s2437_s20 }
  0x11   : > { %391 = vmatpush.bf16.msra.mxu1 %v382_v4  ;;  %2439 = vmatpush.bf16.msra.mxu3 %v382_v4  ;;  %s2550_s24 = scalar_lea.vmem %s3712_s0, %s2440_s21 }
  0x12   : > { %v2553_v5 = vld [vmem:[%s2550_s24 + $0x80] sm:$0xff]  ;;  %v234_v6 = vld [vmem:[%s2550_s24 + $0x90] sm:$0xff]  ;;  %2438 = vmatpush.bf16.msra.mxu2 %v306_v45  ;;  %315 = vmatpush.bf16.msra.mxu0 %v306_v45 }
  0x13   : > { %v225_v7 = vld [vmem:[%s2550_s24] sm:$0xff]  ;;  %v2558_v8 = vpack.c.bf16 %v234_v6, %v2553_v5  ;;  %v226_v9 = vld [vmem:[%s2550_s24 + $0x10] sm:$0xff] }
  0x14   : > { %v235_v10 = vld [vmem:[%s2550_s24 + $0xa0] sm:$0xff]  ;;  %v236_v11 = vld [vmem:[%s2550_s24 + $0xb0] sm:$0xff]  ;;  %v241_v12 = vpack.c.bf16 %v226_v9, %v225_v7 }
  0x15   : > { %v2563_v13 = vpack.c.bf16 %v236_v11, %v235_v10  ;;  %268 = vrot.lane.b32.xlu0 %v2558_v8, %s2494_s25  ;;  %2223 = vmatmul.msk.bf16.vlgmr.msra.gmra.mxu3 %vm276_vm2, %v2558_v8  ;;  %v237_v14 = vld [vmem:[%s2550_s24 + $0xc0] sm:$0xff]  ;;  %v238_v15 = vld [vmem:[%s2550_s24 + $0xd0] sm:$0xff]  ;;  %v574_v37 = vpack.c.bf16 %v235_v10, %v234_v6 }
  0x16   : > { %2219 = vmatmul.msk.bf16.vlgmr.msra.gmra.mxu1 %vm276_vm2, %v241_v12  ;;  %v2574_v16 = vpack.c.bf16 %v238_v15, %v237_v14  ;;  %v227_v17 = vld [vmem:[%s2550_s24 + $0x20] sm:$0xff]  ;;  %v228_v18 = vld [vmem:[%s2550_s24 + $0x30] sm:$0xff]  ;;  %614 = vmatpush.bf16.msrb.mxu3 %v605_v32  ;;  %v2621_v35 = vpack.c.bf16 %v237_v14, %v236_v11 }
  0x17   : > { %270 = vrot.lane.b32.xlu1 %v2563_v13, %s2494_s25  ;;  %v229_v19 = vld [vmem:[%s2550_s24 + $0x40] sm:$0xff]  ;;  %v230_v20 = vld [vmem:[%s2550_s24 + $0x50] sm:$0xff]  ;;  %v2582_v21 = vpack.c.bf16 %v228_v18, %v227_v17  ;;  %v570_v31 = vpack.c.bf16 %v227_v17, %v226_v9  ;;  %850 = vmatpush.bf16.msrb.mxu1 %v841_v33 }
  0x18   : > { %272 = vrot.lane.b32.xlu2 %v2574_v16, %s2494_s25  ;;  %v2587_v22 = vpack.c.bf16 %v230_v20, %v229_v19  ;;  %v239_v23 = vld [vmem:[%s2550_s24 + $0xe0] sm:$0xff]  ;;  %v240_v24 = vld [vmem:[%s2550_s24 + $0xf0] sm:$0xff]  ;;  %v571_v36 = vpack.c.bf16 %v229_v19, %v228_v18  ;;  %493 = vmatpush.bf16.msrb.mxu2 %v484_v51  ;;  %v2311_v19 = vld [vmem:[%s3713_s1 + $0xc] sm:$0x3] }
  0x19   : > { %v2593_v25 = vpack.c.bf16 %v240_v24, %v239_v23  ;;  %v231_v26 = vld [vmem:[%s2550_s24 + $0x60] sm:$0xff]  ;;  %v232_v27 = vld [vmem:[%s2550_s24 + $0x70] sm:$0xff]  ;;  %v2664_v46 = vpack.c.bf16 %v239_v23, %v238_v15  ;;  %732 = vmatpush.bf16.msrb.mxu0 %v723_v55  ;;  %v2320_v23 = vld [vmem:[%s3713_s1 + $0xe] sm:$0x3] }
  0x1a   : > { %v2597_v28 = vpack.c.bf16 %v232_v27, %v231_v26  ;;  %v572_v34 = vpack.c.bf16 %v231_v26, %v230_v20  ;;  %v2636_v38 = vld [vmem:[%s2550_s24 + $0x11] sm:$0xff]  ;;  %v2639_v39 = vld [vmem:[%s2550_s24 + $0x21] sm:$0xff]  ;;  %v573_v41 = vpack.c.bf16 %v2553_v5, %v232_v27  ;;  %v962_v20 = vand.u32 %v2311_v19, %v2541_v3 }
  0x1b   : > { %3742 = vst [vmem:[#allocation2_spill] sm:$0xff] %v2593_v25  ;;  %v2645_v40 = vpack.c.bf16 %v2639_v39, %v2636_v38  ;;  %v2652_v42 = vld [vmem:[%s2550_s24 + $0x100] sm:$0xff]  ;;  %v2667_v47 = vld [vmem:[%s2550_s24 + $0x31] sm:$0xff] }
  0x1c   : > { %v2658_v44 = vpack.c.bf16 %v2652_v42, %v240_v24  ;;  %v2670_v48 = vld [vmem:[%s2550_s24 + $0x41] sm:$0xff]  ;;  %v2692_v52 = vld [vmem:[%s2550_s24 + $0x51] sm:$0xff]  ;;  %v1080_v24 = vand.u32 %v2320_v23, %v2541_v3 }
  0x1d   : > { %260 = vrot.lane.b32.xlu0 %v241_v12, %s2494_s25  ;;  %v2678_v49 = vpack.c.bf16 %v2670_v48, %v2667_v47  ;;  %v2695_v53 = vld [vmem:[%s2550_s24 + $0x61] sm:$0xff]  ;;  %v2711_v57 = vld [vmem:[%s2550_s24 + $0x71] sm:$0xff] }
  0x1e   : > { %v2705_v56 = vpack.c.bf16 %v2695_v53, %v2692_v52  ;;  %v2714_v58 = vld [vmem:[%s2550_s24 + $0x81] sm:$0xff]  ;;  %v2730_v62 = vld [vmem:[%s2550_s24 + $0x91] sm:$0xff]  ;;  %1089 = vmatpush.bf16.msra.mxu3 %v1080_v24 }
  0x1f   : > { %262 = vrot.lane.b32.xlu1 %v2582_v21, %s2494_s25  ;;  %v2718_v59 = vpack.c.bf16 %v2714_v58, %v2711_v57  ;;  %v2733_v63 = vld [vmem:[%s2550_s24 + $0xa1] sm:$0xff]  ;;  %v2757_v7 = vld [vmem:[%s2550_s24 + $0xb1] sm:$0xff] }
  0x20   : > { %264 = vrot.lane.b32.xlu2 %v2587_v22, %s2494_s25  ;;  %v2739_v0 = vpack.c.bf16 %v2733_v63, %v2730_v62  ;;  %v2760_v9 = vld [vmem:[%s2550_s24 + $0xc1] sm:$0xff]  ;;  %v2801_v29 = vld [vmem:[%s2550_s24 + $0xd1] sm:$0xff] }
  0x21   : > { %v2768_v11 = vpack.c.bf16 %v2760_v9, %v2757_v7  ;;  %v433_v15 = vld [vmem:[%s2550_s24 + $0x1] sm:$0xff]  ;;  %v2354_v32 = vld [vmem:[%s3713_s1 + $0x12] sm:$0x3] }
  0x22   : > { %v2780_v17 = vpack.c.bf16 %v2636_v38, %v433_v15  ;;  %v2804_v30 = vld [vmem:[%s2550_s24 + $0xe1] sm:$0xff]  ;;  %v1268_v33 = vand.u32 %v2354_v32, %v2541_v3  ;;  %v2845_v50 = vld [vmem:[%s2550_s24 + $0xf1] sm:$0xff] }
  0x23   : > { %3743 = vst [vmem:[#allocation3_spill] sm:$0xff] %v2768_v11  ;;  %v2848_v51 = vld [vmem:[%s2550_s24 + $0x101] sm:$0xff] }
  0x24   : > { %3744 = vst [vmem:[#allocation4_spill] sm:$0xff] %v2780_v17  ;;  %1277 = vmatpush.bf16.msra.mxu1 %v1268_v33  ;;  %v2858_v54 = vpack.c.bf16 %v2848_v51, %v2845_v50  ;;  %v2888_v33 = vpack.c.bf16 %v2692_v52, %v2670_v48 }
  0x25   : > { %2224 = vmatmul.msk.bf16.gmra.mxu3 %vm276_vm2, %v2563_v13  ;;  %274 = vrot.lane.b32.xlu0 %v2593_v25, %s2494_s25 }
  0x26   : > { %2220 = vmatmul.msk.bf16.gmra.mxu1 %vm276_vm2, %v2582_v21  ;;  %3750 = vst [vmem:[#allocation10_spill] sm:$0xff] %v2858_v54 }
  0x27   : > { %266 = vrot.lane.b32.xlu1 %v2597_v28, %s2494_s25 }
  0x28   : > { %682 = vrot.lane.b32.xlu2 %v570_v31, %s2494_s25 }
  0x2d   : > { %684 = vrot.lane.b32.xlu0 %v571_v36, %s2494_s25 }
  0x2f   : > { %686 = vrot.lane.b32.xlu1 %v572_v34, %s2494_s25 }
  0x30   : > { %688 = vrot.lane.b32.xlu2 %v573_v41, %s2494_s25 }
  0x35   : > { %2225 = vmatmul.msk.bf16.gmra.mxu3 %vm276_vm2, %v2574_v16  ;;  %690 = vrot.lane.b32.xlu0 %v574_v37, %s2494_s25 }
  0x36   : > { %2221 = vmatmul.msk.bf16.gmra.mxu1 %vm276_vm2, %v2587_v22 }
  0x37   : > { %692 = vrot.lane.b32.xlu1 %v2621_v35, %s2494_s25 }
  0x38   : > { %694 = vrot.lane.b32.xlu2 %v2664_v46, %s2494_s25 }
  0x3d   : > { %696 = vrot.lane.b32.xlu0 %v2658_v44, %s2494_s25 }
  0x3f   : > { %1039 = vrot.lane.b32.xlu1 %v2582_v21, %s2494_s25 }
  0x40   : > { %1041 = vrot.lane.b32.xlu2 %v2587_v22, %s2494_s25 }
  0x45   : > { %2226 = vmatmul.msk.bf16.gmra.mxu3 %vm276_vm2, %v2593_v25  ;;  %1043 = vrot.lane.b32.xlu0 %v2597_v28, %s2494_s25 }
  0x46   : > { %2222 = vmatmul.msk.bf16.gmra.mxu1 %vm276_vm2, %v2597_v28 }
  0x47   : > { %1045 = vrot.lane.b32.xlu1 %v2558_v8, %s2494_s25 }
  0x48   : > { %1047 = vrot.lane.b32.xlu2 %v2563_v13, %s2494_s25 }
  0x4d   : > { %1049 = vrot.lane.b32.xlu0 %v2574_v16, %s2494_s25 }
  0x4f   : > { %1051 = vrot.lane.b32.xlu1 %v2593_v25, %s2494_s25 }
  0x55   : > { %2253 = vmatmul.msk.bf16.vlgmr.msrb.gmra.mxu3 %vm276_vm2, %v570_v31  ;;  %1415 = vrot.lane.b32.xlu0 %v2780_v17, %s2494_s25 }
  0x56   : > { %2287 = vmatmul.msk.bf16.vlgmr.msrb.gmra.mxu1 %vm276_vm2, %v2645_v40 }
  0x65   : > { %2254 = vmatmul.msk.bf16.gmra.mxu3 %vm276_vm2, %v571_v36 }
  0x66   : > { %2288 = vmatmul.msk.bf16.gmra.mxu1 %vm276_vm2, %v2678_v49 }
  0x72   : > { %v2770_v12 = vpop.permute.xlu2 %272 }
  0x75   : > { %2255 = vmatmul.msk.bf16.gmra.mxu3 %vm276_vm2, %v572_v34  ;;  %v2816_v34 = vpack.c.bf16 %v2804_v30, %v2801_v29 }
  0x76   : > { %2289 = vmatmul.msk.bf16.gmra.mxu1 %vm276_vm2, %v2705_v56 }
  0x77   : > { %3746 = vst [vmem:[#allocation6_spill] sm:$0xff] %v2816_v34 }
  0x7a   : > { %v2796_v26 = vpop.permute.xlu2 %264 }
  0x82   : > { %v2860_v55 = vpop.permute.xlu2 %682 }
  0x83   : > { %3751 = vst [vmem:[#allocation11_spill] sm:$0xff] %v2860_v55 }
  0x85   : > { %2256 = vmatmul.msk.bf16.gmra.mxu3 %vm276_vm2, %v573_v41  ;;  %v2832_v41 = vpack.c.bf16 %v2667_v47, %v2639_v39 }
  0x86   : > { %2290 = vmatmul.msk.bf16.gmra.mxu1 %vm276_vm2, %v2718_v59 }
  0x87   : > { %v2723_v60 = vpop.permute.xlu0 %268  ;;  %1417 = vrot.lane.b32.xlu1 %v2832_v41, %s2494_s25 }
  0x88   : > { %2215 = vmatmul.msk.bf16.vlgmr.msra.gmra.mxu2 %vm276_vm2, %v2723_v60 }
  0x89   : > { %v2743_v2 = vpop.permute.xlu1 %270  ;;  %971 = vmatpush.bf16.msra.mxu2 %v962_v20  ;;  %v2310_v20 = vld [vmem:[%s2550_s24 + $0x110] sm:$0xff] }
  0x8a   : > { %v2874_v23 = vpack.c.bf16 %v2310_v20, %v2652_v42  ;;  %v2904_v20 = vpack.c.bf16 %v2711_v57, %v2695_v53  ;;  %v2930_v57 = vpack.c.bf16 %v2730_v62, %v2714_v58  ;;  %v2956_v62 = vpack.c.bf16 %v2757_v7, %v2733_v63 }
  0x8b   : > { %v2980_v7 = vpack.c.bf16 %v2801_v29, %v2760_v9 }
  0x8c   : > { %3754 = vst [vmem:[#allocation14_spill] sm:$0xff] %v2874_v23  ;;  %1053 = vrot.lane.b32.xlu2 %v2874_v23, %s2494_s25  ;;  %1421 = vrot.lane.b32.xlu0 %v2904_v20, %s2494_s25 }
  0x8f   : > { %v2727_v61 = vpop.permute.xlu0 %260  ;;  %1423 = vrot.lane.b32.xlu1 %v2930_v57, %s2494_s25 }
  0x90   : > { %2211 = vmatmul.msk.bf16.vlgmr.msra.gmra.mxu0 %vm276_vm2, %v2727_v61 }
  0x91   : > { %v2754_v6 = vpop.permute.xlu1 %262 }
  0x93   : > { %v2741_v1 = vpop.f32.mrf.mxu1 }
  0x94   : > { %1419 = vrot.lane.b32.xlu2 %v2888_v33, %s2494_s25  ;;  %1427 = vrot.lane.b32.xlu0 %v2980_v7, %s2494_s25 }
  0x95   : > { %2257 = vmatmul.msk.bf16.gmra.mxu3 %vm276_vm2, %v574_v37 }
  0x96   : > { %2291 = vmatmul.msk.bf16.gmra.mxu1 %vm276_vm2, %v2739_v0 }
  0x97   : > { %v2826_v38 = vpop.permute.xlu0 %274 }
  0x98   : > { %2216 = vmatmul.msk.bf16.gmra.mxu2 %vm276_vm2, %v2743_v2  ;;  %v2750_v4 = vpop.f32.mrf.mxu3 }
  0x99   : > { %v2821_v36 = vpop.permute.xlu1 %266 }
  0x9b   : > { %v2752_v5 = vpop.f32.mrf.mxu1 }
  0x9c   : > { %1425 = vrot.lane.b32.xlu2 %v2956_v62, %s2494_s25  ;;  %1931 = vrot.lane.b32.xlu0 %v2832_v41, %s2494_s25 }
  0x9f   : > { %v2894_v42 = vpop.permute.xlu0 %684 }
  0xa0   : > { %2212 = vmatmul.msk.bf16.gmra.mxu0 %vm276_vm2, %v2754_v6  ;;  %v2764_v10 = vpop.f32.mrf.mxu3  ;;  %3758 = vst [vmem:[#allocation18_spill] sm:$0xff] %v2894_v42 }
  0xa3   : > { %v2772_v14 = vpop.f32.mrf.mxu1 }
  0xa4   : > { %1673 = vrot.lane.b32.xlu2 %v2645_v40, %s2494_s25  ;;  %1677 = vrot.lane.b32.xlu0 %v2705_v56, %s2494_s25 }
  0xa5   : > { %2258 = vmatmul.msk.bf16.gmra.mxu3 %vm276_vm2, %v2621_v35  ;;  %v2345_v35 = vld [vmem:[%s3713_s1 + $0x10] sm:$0x3] }
  0xa6   : > { %2292 = vmatmul.msk.bf16.gmra.mxu1 %vm276_vm2, %v2768_v11  ;;  %v1198_v37 = vand.u32 %v2345_v35, %v2541_v3 }
  0xa8   : > { %2217 = vmatmul.msk.bf16.gmra.mxu2 %vm276_vm2, %v2770_v12  ;;  %v2784_v18 = vpop.f32.mrf.mxu3  ;;  %1207 = vmatpush.bf16.msra.mxu0 %v1198_v37 }
  0xab   : > { %v2798_v27 = vpop.f32.mrf.mxu1 }
  0xac   : > { %1933 = vrot.lane.b32.xlu2 %v2888_v33, %s2494_s25  ;;  %1937 = vrot.lane.b32.xlu0 %v2930_v57, %s2494_s25 }
  0xb0   : > { %2213 = vmatmul.msk.bf16.gmra.mxu0 %vm276_vm2, %v2796_v26  ;;  %v2808_v31 = vpop.f32.mrf.mxu3 }
  0xb1   : > { %3745 = vst [vmem:[#allocation5_spill] sm:$0xff] %v2808_v31 }
  0xb3   : > { %v2834_v43 = vpop.f32.mrf.mxu1 }
  0xb4   : > { %1679 = vrot.lane.b32.xlu2 %v2718_v59, %s2494_s25  ;;  %1683 = vrot.lane.b32.xlu0 %v2768_v11, %s2494_s25 }
  0xb5   : > { %2259 = vmatmul.msk.bf16.gmra.mxu3 %vm276_vm2, %v2664_v46  ;;  %v2842_v46 = vpop.permute.xlu1 %686 }
  0xb6   : > { %2293 = vmatmul.msk.bf16.gmra.mxu1 %vm276_vm2, %v2816_v34  ;;  %3748 = vst [vmem:[#allocation8_spill] sm:$0xff] %v2842_v46 }
  0xb8   : > { %2218 = vmatmul.msk.bf16.gmra.mxu2 %vm276_vm2, %v2826_v38  ;;  %v2838_v45 = vpop.f32.mrf.mxu3 }
  0xb9   : > { %3747 = vst [vmem:[#allocation7_spill] sm:$0xff] %v2838_v45 }
  0xbb   : > { %v2854_v47 = vpop.f32.mrf.mxu1 }
  0xbc   : > { %1939 = vrot.lane.b32.xlu2 %v2956_v62, %s2494_s25 }
  0xbd   : > { %v2870_v19 = vpop.permute.xlu1 %692 }
  0xbe   : > { %3753 = vst [vmem:[#allocation13_spill] sm:$0xff] %v2870_v19 }
  0xc0   : > { %2214 = vmatmul.msk.bf16.gmra.mxu0 %vm276_vm2, %v2821_v36  ;;  %v2852_v39 = vpop.f32.mrf.mxu3 }
  0xc1   : > { %3749 = vst [vmem:[#allocation9_spill] sm:$0xff] %v2852_v39  ;;  %v2372_v39 = vld [vmem:[%s3713_s1 + $0x16] sm:$0x3] }
  0xc3   : > { %v2878_v24 = vpop.f32.mrf.mxu1 }
  0xc4   : > { %1685 = vrot.lane.b32.xlu2 %v2816_v34, %s2494_s25  ;;  %v2363_v34 = vld [vmem:[%s3713_s1 + $0x14] sm:$0x3] }
  0xc5   : > { %2260 = vmatmul.msk.bf16.gmra.mxu3 %vm276_vm2, %v2658_v44  ;;  %v2880_v44 = vpop.permute.xlu2 %688  ;;  %v2890_v35 = vpop.permute.xlu1 %1039 }
  0xc6   : > { %2294 = vmatmul.msk.bf16.gmra.mxu1 %vm276_vm2, %v2858_v54  ;;  %3755 = vst [vmem:[#allocation15_spill] sm:$0xff] %v2880_v44 }
  0xc7   : > { %3757 = vst [vmem:[#allocation17_spill] sm:$0xff] %v2890_v35 }
  0xc8   : > { %v2866_v15 = vpop.f32.mrf.mxu3  ;;  %2228 = vmatmul.msk.bf16.vlgmr.msrb.gmra.mxu2 %vm276_vm2, %v2780_v17 }
  0xc9   : > { %3752 = vst [vmem:[#allocation12_spill] sm:$0xff] %v2866_v15 }
  0xcb   : > { %v2898_v37 = vpop.f32.mrf.mxu1 }
  0xcd   : > { %v2910_v52 = vpop.permute.xlu2 %694  ;;  %v2972_v63 = vpop.permute.xlu1 %1045 }
  0xce   : > { %3759 = vst [vmem:[#allocation19_spill] sm:$0xff] %v2910_v52 }
  0xcf   : > { %3768 = vst [vmem:[#allocation28_spill] sm:$0xff] %v2972_v63 }
  0xd0   : > { %v2882_v32 = vpop.f32.mrf.mxu3  ;;  %2262 = vmatmul.msk.bf16.vlgmr.msrb.gmra.mxu0 %vm276_vm2, %v2860_v55 }
  0xd1   : > { %3756 = vst [vmem:[#allocation16_spill] sm:$0xff] %v2882_v32 }
  0xd3   : > { %v2916_v55 = vpop.f32.mrf.mxu1 }
  0xd4   : > { %3761 = vst [vmem:[#allocation21_spill] sm:$0xff] %v2916_v55 }
  0xd5   : > { %2321 = vmatmul.msk.bf16.vlgmr.msra.gmra.mxu3 %vm276_vm2, %v2890_v35  ;;  %v2914_v35 = vpop.permute.xlu0 %690  ;;  %v2922_v53 = vpop.permute.xlu2 %1041 }
  0xd6   : > { %2355 = vmatmul.msk.bf16.vlgmr.msra.gmra.mxu1 %vm276_vm2, %v2727_v61  ;;  %3760 = vst [vmem:[#allocation20_spill] sm:$0xff] %v2914_v35 }
  0xd7   : > { %3762 = vst [vmem:[#allocation22_spill] sm:$0xff] %v2922_v53 }
  0xd8   : > { %2229 = vmatmul.msk.bf16.gmra.mxu2 %vm276_vm2, %v2832_v41  ;;  %v2908_v48 = vpop.f32.mrf.mxu3 }
  0xdd   : > { %v2936_v55 = vpop.permute.xlu0 %696  ;;  %v3006_v29 = vpop.permute.xlu2 %1047 }
  0xde   : > { %3763 = vst [vmem:[#allocation23_spill] sm:$0xff] %v2936_v55 }
  0xdf   : > { %3771 = vst [vmem:[#allocation31_spill] sm:$0xff] %v3006_v29 }
  0xe0   : > { %v2918_v17 = vpop.f32.mrf.mxu3  ;;  %2263 = vmatmul.msk.bf16.gmra.mxu0 %vm276_vm2, %v2894_v42  ;;  %v2940_v42 = vpop.f32.mrf.mxu1 }
  0xe1   : > { %3764 = vst [vmem:[#allocation24_spill] sm:$0xff] %v2940_v42 }
  0xe5   : > { %2322 = vmatmul.msk.bf16.gmra.mxu3 %vm276_vm2, %v2922_v53 }
  0xe6   : > { %2356 = vmatmul.msk.bf16.gmra.mxu1 %vm276_vm2, %v2754_v6  ;;  %v2946_v6 = vpop.permute.xlu0 %1043 }
  0xe7   : > { %3765 = vst [vmem:[#allocation25_spill] sm:$0xff] %v2946_v6 }
  0xe8   : > { %2230 = vmatmul.msk.bf16.gmra.mxu2 %vm276_vm2, %v2888_v33  ;;  %v2934_v61 = vpop.f32.mrf.mxu3  ;;  %v2948_v58 = vpop.f32.mrf.mxu1 }
  0xe9   : > { %3766 = vst [vmem:[#allocation26_spill] sm:$0xff] %v2948_v58 }
  0xee   : > { %v3046_v32 = vpop.permute.xlu0 %1049 }
  0xef   : > { %3774 = vst [vmem:[#allocation34_spill] sm:$0xff] %v3046_v32 }
  0xf0   : > { %v2942_v53 = vpop.f32.mrf.mxu3  ;;  %2264 = vmatmul.msk.bf16.gmra.mxu0 %vm276_vm2, %v2842_v46  ;;  %v2964_v46 = vpop.f32.mrf.mxu1 }
  0xf1   : > { %3767 = vst [vmem:[#allocation27_spill] sm:$0xff] %v2964_v46 }
  0xf5   : > { %2323 = vmatmul.msk.bf16.gmra.mxu3 %vm276_vm2, %v2946_v6 }
  0xf6   : > { %2357 = vmatmul.msk.bf16.gmra.mxu1 %vm276_vm2, %v2796_v26 }
  0xf8   : > { %2231 = vmatmul.msk.bf16.gmra.mxu2 %vm276_vm2, %v2904_v20  ;;  %v2960_v42 = vpop.f32.mrf.mxu3  ;;  %v2982_v26 = vpop.f32.mrf.mxu1 }
  0xf9   : > { %3769 = vst [vmem:[#allocation29_spill] sm:$0xff] %v2982_v26 }
 0x100   : > { %v2966_v58 = vpop.f32.mrf.mxu3  ;;  %2265 = vmatmul.msk.bf16.gmra.mxu0 %vm276_vm2, %v2880_v44  ;;  %v3004_v9 = vpop.f32.mrf.mxu1 }
 0x101   : > { %3770 = vst [vmem:[#allocation30_spill] sm:$0xff] %v3004_v9 }
 0x105   : > { %2324 = vmatmul.msk.bf16.gmra.mxu3 %vm276_vm2, %v2972_v63 }
 0x106   : > { %2358 = vmatmul.msk.bf16.gmra.mxu1 %vm276_vm2, %v2821_v36 }
 0x108   : > { %2232 = vmatmul.msk.bf16.gmra.mxu2 %vm276_vm2, %v2930_v57  ;;  %v2986_v44 = vpop.f32.mrf.mxu3 }
 0x10b   : > { %v2992_v63 = vpop.f32.mrf.mxu2 }
 0x10d   : > { %v2994_v36 = vpop.f32.mrf.mxu0 }
 0x110   : > { %v2996_v6 = vpop.f32.mrf.mxu3  ;;  %2266 = vmatmul.msk.bf16.gmra.mxu0 %vm276_vm2, %v2914_v35  ;;  %v3018_v35 = vpack.c.bf16 %v2845_v50, %v2804_v30 }
 0x112   : > { %3772 = vst [vmem:[#allocation32_spill] sm:$0xff] %v3018_v35  ;;  %1429 = vrot.lane.b32.xlu1 %v3018_v35, %s2494_s25  ;;  %1943 = vrot.lane.b32.xlu0 %v3018_v35, %s2494_s25 }
 0x113   : > { %v3008_v26 = vpop.f32.mrf.mxu2 }
 0x115   : > { %v3010_v46 = vpop.f32.mrf.mxu0  ;;  %2325 = vmatmul.msk.bf16.gmra.mxu3 %vm276_vm2, %v3006_v29 }
 0x116   : > { %2359 = vmatmul.msk.bf16.gmra.mxu1 %vm276_vm2, %v2723_v60  ;;  %v3032_v60 = vpop.f32.mrf.mxu1 }
 0x117   : > { %3773 = vst [vmem:[#allocation33_spill] sm:$0xff] %v3032_v60 }
 0x118   : > { %2233 = vmatmul.msk.bf16.gmra.mxu2 %vm276_vm2, %v2956_v62  ;;  %v3022_v9 = vpop.f32.mrf.mxu3 }
 0x11a   : > { %1675 = vrot.lane.b32.xlu1 %v2678_v49, %s2494_s25 }
 0x11b   : > { %v3030_v29 = vpop.f32.mrf.mxu2 }
 0x11d   : > { %v3034_v30 = vpop.f32.mrf.mxu0 }
 0x11e   : > { %v3054_v23 = vpop.f32.mrf.mxu1 }
 0x11f   : > { %3775 = vst [vmem:[#allocation35_spill] sm:$0xff] %v3054_v23 }
 0x120   : > { %v3036_v50 = vpop.f32.mrf.mxu3  ;;  %2267 = vmatmul.msk.bf16.gmra.mxu0 %vm276_vm2, %v2870_v19 }
 0x122   : > { %1935 = vrot.lane.b32.xlu1 %v2904_v20, %s2494_s25 }
 0x123   : > { %v3048_v15 = vpop.f32.mrf.mxu2 }
 0x125   : > { %v3050_v60 = vpop.f32.mrf.mxu0  ;;  %2326 = vmatmul.msk.bf16.gmra.mxu3 %vm276_vm2, %v3046_v32  ;;  %v1338_v32 = vand.u32 %v2363_v34, %v2541_v3  ;;  %v3088_v34 = vpop.permute.xlu1 %1051 }
 0x126   : > { %2360 = vmatmul.msk.bf16.gmra.mxu1 %vm276_vm2, %v2743_v2  ;;  %v1456_v2 = vand.u32 %v2372_v39, %v2541_v3  ;;  %v3078_v25 = vpop.f32.mrf.mxu1  ;;  %3778 = vst [vmem:[#allocation38_spill] sm:$0xff] %v3088_v34 }
 0x127   : > { %1347 = vmatpush.bf16.msrb.mxu2 %v1338_v32  ;;  %3777 = vst [vmem:[#allocation37_spill] sm:$0xff] %v3078_v25  ;;  %v2381_v32 = vld [vmem:[%s3713_s1 + $0x18] sm:$0x3] }
 0x128   : > { %2234 = vmatmul.msk.bf16.gmra.mxu2 %vm276_vm2, %v2980_v7  ;;  %v3060_v19 = vpop.f32.mrf.mxu3  ;;  %1465 = vmatpush.bf16.msrb.mxu3 %v1456_v2  ;;  %v1526_v2 = vand.u32 %v2381_v32, %v2541_v3 }
 0x12a   : > { %1681 = vrot.lane.b32.xlu1 %v2739_v0, %s2494_s25  ;;  %1535 = vmatpush.bf16.msrb.mxu0 %v1526_v2 }
 0x12b   : > { %v3074_v23 = vpop.f32.mrf.mxu2 }
 0x12c   : > { %3776 = vst [vmem:[#allocation36_spill] sm:$0xff] %v3074_v23 }
 0x12d   : > { %v3076_v45 = vpop.f32.mrf.mxu0 }
 0x130   : > { %v3080_v31 = vpop.f32.mrf.mxu3  ;;  %2268 = vmatmul.msk.bf16.gmra.mxu0 %vm276_vm2, %v2910_v52  ;;  %v2390_v52 = vld [vmem:[%s3713_s1 + $0x1a] sm:$0x3] }
 0x131   : > { %v1596_v23 = vand.u32 %v2390_v52, %v2541_v3 }
 0x132   : > { %1941 = vrot.lane.b32.xlu1 %v2980_v7, %s2494_s25 }
 0x133   : > { %v3090_v39 = vpop.f32.mrf.mxu2  ;;  %1605 = vmatpush.bf16.msrb.mxu1 %v1596_v23  ;;  %v3124_v23 = vpop.permute.xlu2 %1053 }
 0x134   : > { %3779 = vst [vmem:[#allocation39_spill] sm:$0xff] %v3090_v39  ;;  %v3112_v39 = vpop.f32.mrf.mxu1 }
 0x135   : > { %v3099_v25 = vpop.f32.mrf.mxu0  ;;  %2327 = vmatmul.msk.bf16.gmra.mxu3 %vm276_vm2, %v3088_v34  ;;  %3781 = vst [vmem:[#allocation41_spill] sm:$0xff] %v3112_v39 }
 0x136   : > { %2361 = vmatmul.msk.bf16.gmra.mxu1 %vm276_vm2, %v2770_v12  ;;  %3784 = vst [vmem:[#allocation44_spill] sm:$0xff] %v3124_v23 }
 0x138   : > { %2235 = vmatmul.msk.bf16.gmra.mxu2 %vm276_vm2, %v3018_v35  ;;  %v3108_v32 = vpop.f32.mrf.mxu3 }
 0x139   : > { %3780 = vst [vmem:[#allocation40_spill] sm:$0xff] %v3108_v32 }
 0x13a   : > { %1687 = vrot.lane.b32.xlu1 %v2858_v54, %s2494_s25 }
 0x13b   : > { %v3114_v11 = vpop.f32.mrf.mxu2 }
 0x13c   : > { %3782 = vst [vmem:[#allocation42_spill] sm:$0xff] %v3114_v11  ;;  %v3128_v2 = vpop.f32.mrf.mxu1 }
 0x13d   : > { %v3116_v34 = vpop.f32.mrf.mxu0  ;;  %3786 = vst [vmem:[#allocation46_spill] sm:$0xff] %v3128_v2 }
 0x140   : > { %2269 = vmatmul.msk.bf16.gmra.mxu0 %vm276_vm2, %v2936_v55  ;;  %v3122_v12 = vpop.f32.mrf.mxu3  ;;  %v394_v55 = vadd.f32 %v2741_v1, %v2994_v36 }
 0x141   : > { %3783 = vst [vmem:[#allocation43_spill] sm:$0xff] %v3122_v12 }
 0x143   : > { %v3126_v52 = vpop.f32.mrf.mxu2 }
 0x144   : > { %3785 = vst [vmem:[#allocation45_spill] sm:$0xff] %v3126_v52  ;;  %v3142_v2 = vpop.f32.mrf.mxu1 }
 0x145   : > { %v3130_v35 = vpop.f32.mrf.mxu0  ;;  %2328 = vmatmul.msk.bf16.gmra.mxu3 %vm276_vm2, %v3124_v23 }
 0x146   : > { %2362 = vmatmul.msk.bf16.gmra.mxu1 %vm276_vm2, %v2826_v38  ;;  %v1416_v38 = vpop.permute.xlu0 %1415 }
 0x148   : > { %2312 = vmatmul.msk.bf16.vlgmr.msra.gmra.mxu2 %vm276_vm2, %v2582_v21  ;;  %v3140_v39 = vpop.f32.mrf.mxu3  ;;  %v396_v21 = vadd.f32 %v2752_v5, %v3010_v46  ;;  %v399_v5 = vadd.f32 %v2772_v14, %v3034_v30 }
 0x149   : > { %3787 = vst [vmem:[#allocation47_spill] sm:$0xff] %v3140_v39 }
 0x14b   : > { %v495_v54 = vpop.f32.mrf.mxu2 }
 0x14c   : > { %v535_v52 = vadd.f32 %v495_v54, %v394_v55 }
 0x14d   : > { %v734_v11 = vpop.f32.mrf.mxu0 }
 0x14e   : > { %v656_v12 = vadd.f32 %v2908_v48, %v535_v52 }
 0x150   : > { %v3145_v32 = vadd.f32 %v734_v11, %v656_v12  ;;  %2346 = vmatmul.msk.bf16.vlgmr.msra.gmra.mxu0 %vm276_vm2, %v2832_v41  ;;  %v3151_v36 = vpop.f32.mrf.mxu3  ;;  %v3157_v11 = vpop.f32.mrf.mxu1 }
 0x153   : > { %v497_v23 = vpop.f32.mrf.mxu2 }
 0x154   : > { %v536_v1 = vadd.f32 %v497_v23, %v396_v21 }
 0x155   : > { %v736_v39 = vpop.f32.mrf.mxu0  ;;  %2373 = vmatmul.msk.bf16.vlgmr.msrb.gmra.mxu3 %vm276_vm2, %v1416_v38 }
 0x156   : > { %v657_v54 = vadd.f32 %v2918_v17, %v536_v1  ;;  %2391 = vmatmul.msk.bf16.vlgmr.msrb.gmra.mxu1 %vm276_vm2, %v2645_v40  ;;  %v401_v40 = vadd.f32 %v2798_v27, %v3050_v60  ;;  %v404_v27 = vadd.f32 %v2834_v43, %v3076_v45 }
 0x158   : > { %v3159_v55 = vadd.f32 %v736_v39, %v657_v54  ;;  %2313 = vmatmul.msk.bf16.gmra.mxu2 %vm276_vm2, %v2587_v22  ;;  %v3166_v52 = vpop.f32.mrf.mxu3  ;;  %v3174_v39 = vpop.f32.mrf.mxu1 }
 0x159   : > { %v1418_v22 = vpop.permute.xlu1 %1417 }
 0x15b   : > { %v500_v46 = vpop.f32.mrf.mxu2 }
 0x15c   : > { %v537_v48 = vadd.f32 %v500_v46, %v399_v5 }
 0x15d   : > { %v739_v12 = vpop.f32.mrf.mxu0 }
 0x15e   : > { %v658_v23 = vadd.f32 %v2934_v61, %v537_v48 }
 0x160   : > { %v3168_v17 = vadd.f32 %v739_v12, %v658_v23  ;;  %2347 = vmatmul.msk.bf16.gmra.mxu0 %vm276_vm2, %v2888_v33  ;;  %v3184_v1 = vpop.f32.mrf.mxu3  ;;  %v3188_v54 = vpop.f32.mrf.mxu1 }
 0x163   : > { %v502_v21 = vpop.f32.mrf.mxu2 }
 0x164   : > { %v538_v14 = vadd.f32 %v502_v21, %v401_v40 }
 0x165   : > { %v741_v30 = vpop.f32.mrf.mxu0  ;;  %2374 = vmatmul.msk.bf16.gmra.mxu3 %vm276_vm2, %v1418_v22 }
 0x166   : > { %v659_v61 = vadd.f32 %v2942_v53, %v538_v14  ;;  %2392 = vmatmul.msk.bf16.gmra.mxu1 %vm276_vm2, %v2678_v49  ;;  %v1420_v49 = vpop.permute.xlu2 %1419 }
 0x168   : > { %v3180_v38 = vadd.f32 %v741_v30, %v659_v61  ;;  %2314 = vmatmul.msk.bf16.gmra.mxu2 %vm276_vm2, %v2597_v28  ;;  %v406_v28 = vadd.f32 %v2854_v47, %v3099_v25  ;;  %v3197_v12 = vpop.f32.mrf.mxu3  ;;  %v3200_v40 = vpop.f32.mrf.mxu1  ;;  %v409_v25 = vadd.f32 %v2878_v24, %v3116_v34 }
 0x16b   : > { %v505_v60 = vpop.f32.mrf.mxu2 }
 0x16c   : > { %v539_v5 = vadd.f32 %v505_v60, %v404_v27 }
 0x16d   : > { %v744_v46 = vpop.f32.mrf.mxu0 }
 0x16e   : > { %v660_v53 = vadd.f32 %v2960_v42, %v539_v5 }
 0x170   : > { %v3191_v48 = vadd.f32 %v744_v46, %v660_v53  ;;  %2348 = vmatmul.msk.bf16.gmra.mxu0 %vm276_vm2, %v2904_v20  ;;  %v3211_v14 = vpop.f32.mrf.mxu3  ;;  %v3214_v27 = vpop.f32.mrf.mxu1 }
 0x173   : > { %v507_v23 = vpop.f32.mrf.mxu2 }
 0x174   : > { %v540_v43 = vadd.f32 %v507_v23, %v406_v28 }
 0x175   : > { %v746_v45 = vpop.f32.mrf.mxu0  ;;  %2375 = vmatmul.msk.bf16.gmra.mxu3 %vm276_vm2, %v1420_v49 }
 0x176   : > { %v661_v42 = vadd.f32 %v2966_v58, %v540_v43  ;;  %2393 = vmatmul.msk.bf16.gmra.mxu1 %vm276_vm2, %v2705_v56  ;;  %v1422_v56 = vpop.permute.xlu0 %1421  ;;  %v1424_v43 = vpop.permute.xlu1 %1423 }
 0x178   : > { %v3205_v22 = vadd.f32 %v746_v45, %v661_v42  ;;  %2315 = vmatmul.msk.bf16.gmra.mxu2 %vm276_vm2, %v2558_v8  ;;  %v411_v8 = vadd.f32 %v2898_v37, %v3130_v35  ;;  %v414_v35 = vadd.f32 %v2750_v4, %v2992_v63  ;;  %v3234_v37 = vpop.f32.mrf.mxu1 }
 0x17b   : > { %v510_v47 = vpop.f32.mrf.mxu2 }
 0x17c   : > { %v541_v21 = vadd.f32 %v510_v47, %v409_v25 }
 0x17d   : > { %v749_v30 = vpop.f32.mrf.mxu0 }
 0x17e   : > { %v662_v61 = vadd.f32 %v2986_v44, %v541_v21  ;;  %v3226_v44 = vpop.f32.mrf.mxu3 }
 0x180   : > { %v3216_v58 = vadd.f32 %v749_v30, %v662_v61  ;;  %2349 = vmatmul.msk.bf16.gmra.mxu0 %vm276_vm2, %v2930_v57  ;;  %v3245_v4 = vpop.f32.mrf.mxu1 }
 0x183   : > { %v512_v60 = vpop.f32.mrf.mxu2 }
 0x184   : > { %v542_v24 = vadd.f32 %v512_v60, %v411_v8  ;;  %v2344_v8 = vld [vmem:[%s2550_s24 + $0x111] sm:$0xff] }
 0x185   : > { %v751_v34 = vpop.f32.mrf.mxu0  ;;  %2376 = vmatmul.msk.bf16.gmra.mxu3 %vm276_vm2, %v1422_v56 }
 0x186   : > { %v663_v5 = vadd.f32 %v2996_v6, %v542_v24  ;;  %2394 = vmatmul.msk.bf16.gmra.mxu1 %vm276_vm2, %v2718_v59  ;;  %v3241_v59 = vpop.f32.mrf.mxu3 }
 0x188   : > { %v3228_v46 = vadd.f32 %v751_v34, %v663_v5  ;;  %2316 = vmatmul.msk.bf16.gmra.mxu2 %vm276_vm2, %v2563_v13  ;;  %v416_v13 = vadd.f32 %v2764_v10, %v3008_v26  ;;  %v419_v10 = vadd.f32 %v2784_v18, %v3030_v29  ;;  %v3259_v61 = vpop.f32.mrf.mxu1  ;;  %v1426_v29 = vpop.permute.xlu2 %1425  ;;  %v3790_v5 = vld [vmem:[#allocation3_spill] sm:$0xff] }
 0x18b   : > { %v515_v53 = vpop.f32.mrf.mxu2 }
 0x18c   : > { %v543_v28 = vadd.f32 %v515_v53, %v414_v35 }
 0x18d   : > { %v754_v49 = vpop.f32.mrf.mxu0 }
 0x18e   : > { %v664_v6 = vadd.f32 %v3022_v9, %v543_v28  ;;  %v3257_v26 = vpop.f32.mrf.mxu3  ;;  %v3791_v28 = vld [vmem:[#allocation2_spill] sm:$0xff] }
 0x190   : > { %v3237_v23 = vadd.f32 %v754_v49, %v664_v6  ;;  %2350 = vmatmul.msk.bf16.gmra.mxu0 %vm276_vm2, %v2956_v62  ;;  %v3280_v35 = vpop.f32.mrf.mxu1  ;;  %v3792_v6 = vld [vmem:[#allocation36_spill] sm:$0xff] }
 0x193   : > { %v517_v45 = vpop.f32.mrf.mxu2 }
 0x194   : > { %v544_v63 = vadd.f32 %v517_v45, %v416_v13  ;;  %v3793_v13 = vld [vmem:[#allocation7_spill] sm:$0xff]  ;;  %v2408_v45 = vld [vmem:[%s3713_s1 + $0x1e] sm:$0x3] }
 0x195   : > { %v756_v42 = vpop.f32.mrf.mxu0  ;;  %2377 = vmatmul.msk.bf16.gmra.mxu3 %vm276_vm2, %v1424_v43  ;;  %v424_v43 = vadd.f32 %v3793_v13, %v3792_v6  ;;  %v3798_v6 = vld [vmem:[#allocation43_spill] sm:$0xff] }
 0x196   : > { %v665_v9 = vadd.f32 %v3036_v50, %v544_v63  ;;  %2395 = vmatmul.msk.bf16.gmra.mxu1 %vm276_vm2, %v2739_v0  ;;  %v3264_v0 = vpack.c.bf16 %v2344_v8, %v2848_v51  ;;  %v3274_v34 = vpop.f32.mrf.mxu3  ;;  %v2417_v8 = vld [vmem:[%s3713_s1 + $0x20] sm:$0x3] }
 0x198   : > { %v3251_v25 = vadd.f32 %v756_v42, %v665_v9  ;;  %2317 = vmatmul.msk.bf16.gmra.mxu2 %vm276_vm2, %v2574_v16  ;;  %3788 = vst [vmem:[#allocation48_spill] sm:$0xff] %v3264_v0  ;;  %1945 = vrot.lane.b32.xlu2 %v3264_v0, %s2494_s25  ;;  %v3789_v16 = vld [vmem:[#allocation5_spill] sm:$0xff]  ;;  %v1784_v42 = vand.u32 %v2408_v45, %v2541_v3  ;;  %v3800_v45 = vld [vmem:[#allocation14_spill] sm:$0xff] }
 0x199   : > { %v421_v18 = vadd.f32 %v3789_v16, %v3048_v15  ;;  %v2399_v15 = vld [vmem:[%s3713_s1 + $0x1c] sm:$0x3]  ;;  %v1854_v16 = vand.u32 %v2417_v8, %v2541_v3 }
 0x19a   : > { %v1714_v49 = vand.u32 %v2399_v15, %v2541_v3  ;;  %1793 = vmatpush.bf16.msra.mxu3 %v1784_v42  ;;  %v3801_v42 = vld [vmem:[#allocation42_spill] sm:$0xff] }
 0x19b   : > { %v520_v47 = vpop.f32.mrf.mxu2  ;;  %1863 = vmatpush.bf16.msra.mxu0 %v1854_v16 }
 0x19c   : > { %v545_v21 = vadd.f32 %v520_v47, %v419_v10  ;;  %1723 = vmatpush.bf16.msra.mxu2 %v1714_v49  ;;  %v3794_v10 = vld [vmem:[#allocation40_spill] sm:$0xff] }
 0x19d   : > { %v759_v30 = vpop.f32.mrf.mxu0 }
 0x19e   : > { %v666_v50 = vadd.f32 %v3060_v19, %v545_v21  ;;  %v3297_v21 = vpop.f32.mrf.mxu3 }
 0x1a0   : > { %v3266_v56 = vadd.f32 %v759_v30, %v666_v50  ;;  %2351 = vmatmul.msk.bf16.gmra.mxu0 %vm276_vm2, %v2980_v7  ;;  %v3795_v50 = vld [vmem:[#allocation32_spill] sm:$0xff] }
 0x1a3   : > { %v522_v60 = vpop.f32.mrf.mxu2 }
 0x1a4   : > { %v546_v24 = vadd.f32 %v522_v60, %v421_v18  ;;  %v3796_v18 = vld [vmem:[#allocation39_spill] sm:$0xff] }
 0x1a5   : > { %v761_v19 = vpop.f32.mrf.mxu0  ;;  %2378 = vmatmul.msk.bf16.gmra.mxu3 %vm276_vm2, %v1426_v29  ;;  %v3797_v29 = vld [vmem:[#allocation9_spill] sm:$0xff] }
 0x1a6   : > { %v667_v51 = vadd.f32 %v3080_v31, %v546_v24  ;;  %2396 = vmatmul.msk.bf16.gmra.mxu1 %vm276_vm2, %v3790_v5  ;;  %v426_v60 = vadd.f32 %v3797_v29, %v3796_v18  ;;  %v3309_v24 = vpop.f32.mrf.mxu1  ;;  %v3803_v18 = vld [vmem:[#allocation47_spill] sm:$0xff] }
 0x1a8   : > { %v3282_v53 = vadd.f32 %v761_v19, %v667_v51  ;;  %2318 = vmatmul.msk.bf16.gmra.mxu2 %vm276_vm2, %v3791_v28  ;;  %v1428_v19 = vpop.permute.xlu0 %1427  ;;  %v2426_v28 = vld [vmem:[%s3713_s1 + $0x22] sm:$0x3] }
 0x1a9   : > { %v1972_v49 = vand.u32 %v2426_v28, %v2541_v3  ;;  %v1430_v28 = vpop.permute.xlu1 %1429 }
 0x1ab   : > { %v525_v31 = vpop.f32.mrf.mxu2  ;;  %1981 = vmatpush.bf16.msra.mxu1 %v1972_v49 }
 0x1ac   : > { %v547_v63 = vadd.f32 %v525_v31, %v424_v43  ;;  %v3799_v43 = vld [vmem:[#allocation6_spill] sm:$0xff] }
 0x1ad   : > { %v764_v9 = vpop.f32.mrf.mxu0 }
 0x1ae   : > { %v668_v47 = vadd.f32 %v3794_v10, %v547_v63  ;;  %v3323_v63 = vpop.f32.mrf.mxu3  ;;  %v3327_v8 = vpop.f32.mrf.mxu1 }
 0x1b0   : > { %v3299_v30 = vadd.f32 %v764_v9, %v668_v47  ;;  %2352 = vmatmul.msk.bf16.gmra.mxu0 %vm276_vm2, %v3795_v50  ;;  %v3802_v9 = vld [vmem:[#allocation12_spill] sm:$0xff] }
 0x1b1   : > { %v429_v10 = vadd.f32 %v3802_v9, %v3801_v42  ;;  %v3806_v42 = vld [vmem:[#allocation10_spill] sm:$0xff] }
 0x1b3   : > { %v527_v51 = vpop.f32.mrf.mxu2 }
 0x1b4   : > { %v548_v5 = vadd.f32 %v527_v51, %v426_v60  ;;  %v3805_v51 = vld [vmem:[#allocation16_spill] sm:$0xff] }
 0x1b5   : > { %v766_v15 = vpop.f32.mrf.mxu0  ;;  %2379 = vmatmul.msk.bf16.gmra.mxu3 %vm276_vm2, %v1428_v19  ;;  %v3804_v19 = vld [vmem:[#allocation45_spill] sm:$0xff] }
 0x1b6   : > { %v669_v13 = vadd.f32 %v3798_v6, %v548_v5  ;;  %2397 = vmatmul.msk.bf16.gmra.mxu1 %vm276_vm2, %v3799_v43  ;;  %v431_v5 = vadd.f32 %v3805_v51, %v3804_v19  ;;  %v3339_v43 = vpop.f32.mrf.mxu1 }
 0x1b8   : > { %v3319_v31 = vadd.f32 %v766_v15, %v669_v13  ;;  %2319 = vmatmul.msk.bf16.gmra.mxu2 %vm276_vm2, %v3800_v45  ;;  %v3336_v15 = vpop.f32.mrf.mxu3 }
 0x1bb   : > { %v530_v47 = vpop.f32.mrf.mxu2 }
 0x1bc   : > { %v549_v3 = vadd.f32 %v530_v47, %v429_v10  ;;  %v3807_v10 = vld [vmem:[#allocation4_spill] sm:$0xff]  ;;  %v3808_v47 = vld [vmem:[#allocation21_spill] sm:$0xff] }
 0x1bd   : > { %v769_v16 = vpop.f32.mrf.mxu0 }
 0x1be   : > { %v670_v29 = vadd.f32 %v3803_v18, %v549_v3  ;;  %v892_v3 = vadd.f32 %v3808_v47, %v3145_v32 }
 0x1c0   : > { %v3330_v60 = vadd.f32 %v769_v16, %v670_v29  ;;  %2353 = vmatmul.msk.bf16.gmra.mxu0 %vm276_vm2, %v3264_v0  ;;  %v3350_v29 = vpop.f32.mrf.mxu3 }
 0x1c3   : > { %v532_v49 = vpop.f32.mrf.mxu2 }
 0x1c4   : > { %v550_v6 = vadd.f32 %v532_v49, %v431_v5 }
 0x1c5   : > { %v771_v13 = vpop.f32.mrf.mxu0  ;;  %2380 = vmatmul.msk.bf16.gmra.mxu3 %vm276_vm2, %v1430_v28  ;;  %v3810_v28 = vld [vmem:[#allocation24_spill] sm:$0xff] }
 0x1c6   : > { %v671_v45 = vadd.f32 %v3151_v36, %v550_v6  ;;  %2398 = vmatmul.msk.bf16.gmra.mxu1 %vm276_vm2, %v3806_v42  ;;  %v3809_v36 = vld [vmem:[#allocation11_spill] sm:$0xff]  ;;  %v893_v49 = vadd.f32 %v3810_v28, %v3159_v55  ;;  %v3811_v42 = vld [vmem:[#allocation17_spill] sm:$0xff] }
 0x1c8   : > { %v3344_v9 = vadd.f32 %v771_v13, %v671_v45  ;;  %2364 = vmatmul.msk.bf16.vlgmr.msrb.gmra.mxu2 %vm276_vm2, %v3807_v10  ;;  %v3362_v10 = vpop.f32.mrf.mxu3 }
 0x1cb   : > { %v973_v16 = vpop.f32.mrf.mxu2 }
 0x1cc   : > { %v1013_v18 = vadd.f32 %v973_v16, %v892_v3  ;;  %v3370_v16 = vpop.f32.mrf.mxu1 }
 0x1cd   : > { %v1209_v19 = vpop.f32.mrf.mxu0 }
 0x1ce   : > { %v1131_v51 = vadd.f32 %v3166_v52, %v1013_v18  ;;  %v3812_v52 = vld [vmem:[#allocation26_spill] sm:$0xff] }
 0x1cf   : > { %v894_v3 = vadd.f32 %v3812_v52, %v3168_v17 }
 0x1d0   : > { %v3353_v5 = vadd.f32 %v1209_v19, %v1131_v51  ;;  %2382 = vmatmul.msk.bf16.vlgmr.msrb.gmra.mxu0 %vm276_vm2, %v3809_v36  ;;  %v3377_v28 = vpop.f32.mrf.mxu3 }
 0x1d3   : > { %v975_v6 = vpop.f32.mrf.mxu2 }
 0x1d4   : > { %v1014_v13 = vadd.f32 %v975_v6, %v893_v49  ;;  %v3814_v49 = vld [vmem:[#allocation27_spill] sm:$0xff]  ;;  %v3381_v17 = vpop.f32.mrf.mxu1 }
 0x1d5   : > { %v1211_v45 = vpop.f32.mrf.mxu0  ;;  %2409 = vmatmul.msk.bf16.vlgmr.msra.gmra.mxu3 %vm276_vm2, %v3811_v42  ;;  %v895_v6 = vadd.f32 %v3814_v49, %v3180_v38 }
 0x1d6   : > { %v1132_v32 = vadd.f32 %v3184_v1, %v1014_v13  ;;  %v3813_v1 = vld [vmem:[#allocation18_spill] sm:$0xff] }
 0x1d8   : > { %v3364_v47 = vadd.f32 %v1211_v45, %v1132_v32  ;;  %2365 = vmatmul.msk.bf16.gmra.mxu2 %vm276_vm2, %v2832_v41  ;;  %v3815_v32 = vld [vmem:[#allocation22_spill] sm:$0xff] }
 0x1db   : > { %v978_v55 = vpop.f32.mrf.mxu2 }
 0x1dc   : > { %v1015_v18 = vadd.f32 %v978_v55, %v894_v3  ;;  %v3816_v3 = vld [vmem:[#allocation29_spill] sm:$0xff]  ;;  %v3395_v49 = vpop.f32.mrf.mxu1 }
 0x1dd   : > { %v1214_v19 = vpop.f32.mrf.mxu0  ;;  %v896_v55 = vadd.f32 %v3816_v3, %v3191_v48  ;;  %v3819_v3 = vld [vmem:[#allocation25_spill] sm:$0xff] }
 0x1de   : > { %v1133_v51 = vadd.f32 %v3197_v12, %v1015_v18  ;;  %v3392_v18 = vpop.f32.mrf.mxu3 }
 0x1e0   : > { %v3373_v36 = vadd.f32 %v1214_v19, %v1133_v51  ;;  %2383 = vmatmul.msk.bf16.gmra.mxu0 %vm276_vm2, %v3813_v1 }
 0x1e3   : > { %v980_v13 = vpop.f32.mrf.mxu2 }
 0x1e4   : > { %v1016_v45 = vadd.f32 %v980_v13, %v895_v6  ;;  %v3818_v13 = vld [vmem:[#allocation30_spill] sm:$0xff] }
 0x1e5   : > { %v1216_v42 = vpop.f32.mrf.mxu0  ;;  %2410 = vmatmul.msk.bf16.gmra.mxu3 %vm276_vm2, %v3815_v32 }
 0x1e6   : > { %v1134_v12 = vadd.f32 %v3211_v14, %v1016_v45  ;;  %v3817_v14 = vld [vmem:[#allocation8_spill] sm:$0xff]  ;;  %v897_v45 = vadd.f32 %v3818_v13, %v3205_v22  ;;  %v3403_v48 = vpop.f32.mrf.mxu3 }
 0x1e8   : > { %v3386_v52 = vadd.f32 %v1216_v42, %v1134_v12  ;;  %2366 = vmatmul.msk.bf16.gmra.mxu2 %vm276_vm2, %v2888_v33 }
 0x1eb   : > { %v983_v38 = vpop.f32.mrf.mxu2 }
 0x1ec   : > { %v1017_v19 = vadd.f32 %v983_v38, %v896_v55  ;;  %v3412_v38 = vpop.f32.mrf.mxu1 }
 0x1ed   : > { %v1219_v51 = vpop.f32.mrf.mxu0 }
 0x1ee   : > { %v1135_v1 = vadd.f32 %v3226_v44, %v1017_v19  ;;  %v3820_v19 = vld [vmem:[#allocation33_spill] sm:$0xff] }
 0x1ef   : > { %v898_v22 = vadd.f32 %v3820_v19, %v3216_v58  ;;  %v3824_v19 = vld [vmem:[#allocation28_spill] sm:$0xff] }
 0x1f0   : > { %v3397_v6 = vadd.f32 %v1219_v51, %v1135_v1  ;;  %2384 = vmatmul.msk.bf16.gmra.mxu0 %vm276_vm2, %v3817_v14 }
 0x1f3   : > { %v985_v42 = vpop.f32.mrf.mxu2 }
 0x1f4   : > { %v1018_v32 = vadd.f32 %v985_v42, %v897_v45  ;;  %v3417_v45 = vpop.f32.mrf.mxu3 }
 0x1f5   : > { %v1221_v12 = vpop.f32.mrf.mxu0  ;;  %2411 = vmatmul.msk.bf16.gmra.mxu3 %vm276_vm2, %v3819_v3  ;;  %v3425_v3 = vpop.f32.mrf.mxu1 }
 0x1f6   : > { %v1136_v44 = vadd.f32 %v3241_v59, %v1018_v32  ;;  %v3821_v59 = vld [vmem:[#allocation15_spill] sm:$0xff]  ;;  %3823 = vst [vmem:[#allocation5_spill] sm:$0xff] %v3425_v3 }
 0x1f7   : > { %v3822_v32 = vld [vmem:[#allocation35_spill] sm:$0xff] }
 0x1f8   : > { %v3408_v55 = vadd.f32 %v1221_v12, %v1136_v44  ;;  %2367 = vmatmul.msk.bf16.gmra.mxu2 %vm276_vm2, %v2904_v20  ;;  %v899_v12 = vadd.f32 %v3822_v32, %v3228_v46 }
 0x1fb   : > { %v988_v51 = vpop.f32.mrf.mxu2 }
 0x1fc   : > { %v1019_v1 = vadd.f32 %v988_v51, %v898_v22  ;;  %v3434_v51 = vpop.f32.mrf.mxu3 }
 0x1fd   : > { %v1224_v14 = vpop.f32.mrf.mxu0 }
 0x1fe   : > { %v1137_v13 = vadd.f32 %v3257_v26, %v1019_v1  ;;  %v3825_v1 = vld [vmem:[#allocation37_spill] sm:$0xff] }
 0x1ff   : > { %v900_v46 = vadd.f32 %v3825_v1, %v3237_v23  ;;  %v3828_v1 = vld [vmem:[#allocation31_spill] sm:$0xff] }
 0x200   : > { %v3419_v42 = vadd.f32 %v1224_v14, %v1137_v13  ;;  %2385 = vmatmul.msk.bf16.gmra.mxu0 %vm276_vm2, %v3821_v59  ;;  %v3438_v59 = vpop.f32.mrf.mxu1 }
 0x203   : > { %v990_v44 = vpop.f32.mrf.mxu2 }
 0x204   : > { %v1020_v0 = vadd.f32 %v990_v44, %v899_v12 }
 0x205   : > { %v1226_v58 = vpop.f32.mrf.mxu0  ;;  %2412 = vmatmul.msk.bf16.gmra.mxu3 %vm276_vm2, %v3824_v19  ;;  %v3447_v19 = vpop.f32.mrf.mxu3 }
 0x206   : > { %v1138_v26 = vadd.f32 %v3274_v34, %v1020_v0  ;;  %v3826_v0 = vld [vmem:[#allocation20_spill] sm:$0xff]  ;;  %v3827_v34 = vld [vmem:[#allocation41_spill] sm:$0xff] }
 0x208   : > { %v3430_v22 = vadd.f32 %v1226_v58, %v1138_v26  ;;  %2368 = vmatmul.msk.bf16.gmra.mxu2 %vm276_vm2, %v2930_v57  ;;  %v901_v58 = vadd.f32 %v3827_v34, %v3251_v25 }
 0x20b   : > { %v993_v14 = vpop.f32.mrf.mxu2 }
 0x20c   : > { %v1021_v13 = vadd.f32 %v993_v14, %v900_v46  ;;  %v3452_v14 = vpop.f32.mrf.mxu1 }
 0x20d   : > { %v1229_v32 = vpop.f32.mrf.mxu0  ;;  %3829 = vst [vmem:[#allocation3_spill] sm:$0xff] %v3452_v14 }
 0x20e   : > { %v1139_v12 = vadd.f32 %v3297_v21, %v1021_v13  ;;  %v3830_v13 = vld [vmem:[#allocation46_spill] sm:$0xff] }
 0x20f   : > { %v902_v25 = vadd.f32 %v3830_v13, %v3266_v56  ;;  %v3832_v56 = vld [vmem:[#allocation34_spill] sm:$0xff] }
 0x210   : > { %v3441_v44 = vadd.f32 %v1229_v32, %v1139_v12  ;;  %2386 = vmatmul.msk.bf16.gmra.mxu0 %vm276_vm2, %v3826_v0  ;;  %v3460_v0 = vpop.f32.mrf.mxu3 }
 0x213   : > { %v995_v26 = vpop.f32.mrf.mxu2 }
 0x214   : > { %v1022_v3 = vadd.f32 %v995_v26, %v901_v58 }
 0x215   : > { %v1231_v23 = vpop.f32.mrf.mxu0  ;;  %2413 = vmatmul.msk.bf16.gmra.mxu3 %vm276_vm2, %v3828_v1 }
 0x216   : > { %v1140_v46 = vadd.f32 %v3323_v63, %v1022_v3  ;;  %v3831_v63 = vld [vmem:[#allocation13_spill] sm:$0xff]  ;;  %v1316_v3 = vpop.f32.mrf.mxu1 }
 0x218   : > { %v3454_v21 = vadd.f32 %v1231_v23, %v1140_v46  ;;  %2369 = vmatmul.msk.bf16.gmra.mxu2 %vm276_vm2, %v2956_v62  ;;  %v903_v23 = vadd.f32 %v3142_v2, %v3282_v53 }
 0x21b   : > { %v998_v32 = vpop.f32.mrf.mxu2 }
 0x21c   : > { %v1023_v12 = vadd.f32 %v998_v32, %v902_v25  ;;  %v3472_v25 = vpop.f32.mrf.mxu3 }
 0x21d   : > { %v1234_v34 = vpop.f32.mrf.mxu0 }
 0x21e   : > { %v1141_v58 = vadd.f32 %v3336_v15, %v1023_v12  ;;  %v1607_v32 = vpop.f32.mrf.mxu1  ;;  %v904_v12 = vadd.f32 %v3157_v11, %v3299_v30  ;;  %v1674_v11 = vpop.permute.xlu2 %1673 }
 0x220   : > { %v3463_v26 = vadd.f32 %v1234_v34, %v1141_v58  ;;  %2387 = vmatmul.msk.bf16.gmra.mxu0 %vm276_vm2, %v3831_v63  ;;  %v1932_v34 = vpop.permute.xlu0 %1931 }
 0x221   : > { %2427 = vmatmul.msk.bf16.vlgmr.msra.gmra.mxu1 %vm276_vm2, %v1932_v34  ;;  %v906_v34 = vadd.f32 %v3188_v54, %v3330_v60  ;;  %v1676_v54 = vpop.permute.xlu1 %1675 }
 0x223   : > { %v1000_v1 = vpop.f32.mrf.mxu2 }
 0x224   : > { %v1024_v46 = vadd.f32 %v1000_v1, %v903_v23  ;;  %v3833_v23 = vld [vmem:[#allocation19_spill] sm:$0xff] }
 0x225   : > { %v1236_v14 = vpop.f32.mrf.mxu0  ;;  %2414 = vmatmul.msk.bf16.gmra.mxu3 %vm276_vm2, %v3832_v56 }
 0x226   : > { %v1142_v13 = vadd.f32 %v3350_v29, %v1024_v46  ;;  %v1609_v1 = vpop.f32.mrf.mxu1  ;;  %v905_v46 = vadd.f32 %v3174_v39, %v3319_v31 }
 0x228   : > { %v3474_v15 = vadd.f32 %v1236_v14, %v1142_v13  ;;  %2370 = vmatmul.msk.bf16.gmra.mxu2 %vm276_vm2, %v2980_v7  ;;  %v3486_v14 = vpop.f32.mrf.mxu3 }
 0x22b   : > { %v1003_v2 = vpop.f32.mrf.mxu2 }
 0x22c   : > { %v1025_v53 = vadd.f32 %v1003_v2, %v904_v12  ;;  %v3834_v12 = vld [vmem:[#allocation38_spill] sm:$0xff] }
 0x22d   : > { %v1239_v58 = vpop.f32.mrf.mxu0 }
 0x22e   : > { %v1143_v63 = vadd.f32 %v3362_v10, %v1025_v53  ;;  %v1612_v53 = vpop.f32.mrf.mxu1 }
 0x230   : > { %v3482_v29 = vadd.f32 %v1239_v58, %v1143_v63  ;;  %2388 = vmatmul.msk.bf16.gmra.mxu0 %vm276_vm2, %v3833_v23  ;;  %v1934_v58 = vpop.permute.xlu2 %1933  ;;  %v3499_v39 = vpop.f32.mrf.mxu3 }
 0x231   : > { %2428 = vmatmul.msk.bf16.gmra.mxu1 %vm276_vm2, %v1934_v58 }
 0x233   : > { %v1005_v30 = vpop.f32.mrf.mxu2 }
 0x234   : > { %v1026_v56 = vadd.f32 %v1005_v30, %v905_v46  ;;  %v3835_v30 = vld [vmem:[#allocation23_spill] sm:$0xff] }
 0x235   : > { %v1241_v13 = vpop.f32.mrf.mxu0  ;;  %2415 = vmatmul.msk.bf16.gmra.mxu3 %vm276_vm2, %v3834_v12 }
 0x236   : > { %v1144_v10 = vadd.f32 %v3377_v28, %v1026_v56  ;;  %v1614_v56 = vpop.f32.mrf.mxu1 }
 0x238   : > { %v3493_v2 = vadd.f32 %v1241_v13, %v1144_v10  ;;  %2371 = vmatmul.msk.bf16.gmra.mxu2 %vm276_vm2, %v3795_v50  ;;  %v907_v13 = vadd.f32 %v3200_v40, %v3344_v9  ;;  %v3509_v10 = vpop.f32.mrf.mxu3 }
 0x23b   : > { %v1008_v31 = vpop.f32.mrf.mxu2 }
 0x23c   : > { %v1027_v63 = vadd.f32 %v1008_v31, %v906_v34  ;;  %v3836_v31 = vld [vmem:[#allocation44_spill] sm:$0xff] }
 0x23d   : > { %v1244_v23 = vpop.f32.mrf.mxu0 }
 0x23e   : > { %v1145_v46 = vadd.f32 %v3392_v18, %v1027_v63  ;;  %v1617_v63 = vpop.f32.mrf.mxu1 }
 0x240   : > { %v3503_v28 = vadd.f32 %v1244_v23, %v1145_v46  ;;  %2389 = vmatmul.msk.bf16.gmra.mxu0 %vm276_vm2, %v3835_v30  ;;  %v1319_v23 = vadd.f32 %v3214_v27, %v3353_v5  ;;  %v1936_v46 = vpop.permute.xlu1 %1935 }
 0x241   : > { %2429 = vmatmul.msk.bf16.gmra.mxu1 %vm276_vm2, %v1936_v46 }
 0x243   : > { %v1010_v60 = vpop.f32.mrf.mxu2 }
 0x244   : > { %v1028_v12 = vadd.f32 %v1010_v60, %v907_v13 }
 0x245   : > { %v1246_v34 = vpop.f32.mrf.mxu0  ;;  %2416 = vmatmul.msk.bf16.gmra.mxu3 %vm276_vm2, %v3836_v31 }
 0x246   : > { %v1146_v18 = vadd.f32 %v3403_v48, %v1028_v12  ;;  %v1619_v48 = vpop.f32.mrf.mxu1 }
 0x248   : > { %v1264_v58 = vadd.f32 %v1246_v34, %v1146_v18  ;;  %2400 = vmatmul.msk.bf16.vlgmr.msra.gmra.mxu2 %vm276_vm2, %v1674_v11  ;;  %v1320_v11 = vadd.f32 %v3234_v37, %v3364_v47 }
 0x24a   : > { %v3517_v40 = vadd.f32 %v1316_v3, %v1264_v58  ;;  %v1678_v3 = vpop.permute.xlu0 %1677 }
 0x24b   : > { %v1349_v9 = vpop.f32.mrf.mxu2 }
 0x24c   : > { %v1389_v30 = vadd.f32 %v1349_v9, %v1319_v23  ;;  %v1321_v23 = vadd.f32 %v3245_v4, %v3373_v36  ;;  %v1322_v4 = vadd.f32 %v3259_v61, %v3386_v52  ;;  %v1680_v36 = vpop.permute.xlu2 %1679 }
 0x24d   : > { %v1537_v13 = vpop.f32.mrf.mxu0 }
 0x24e   : > { %v1507_v60 = vadd.f32 %v3417_v45, %v1389_v30  ;;  %v1622_v45 = vpop.f32.mrf.mxu1  ;;  %v3535_v30 = vpop.f32.mrf.mxu3 }
 0x250   : > { %v1577_v31 = vadd.f32 %v1537_v13, %v1507_v60  ;;  %2418 = vmatmul.msk.bf16.vlgmr.msra.gmra.mxu0 %vm276_vm2, %v2832_v41 }
 0x252   : > { %v3525_v12 = vadd.f32 %v1607_v32, %v1577_v31  ;;  %v1938_v37 = vpop.permute.xlu0 %1937 }
 0x253   : > { %v1351_v27 = vpop.f32.mrf.mxu2  ;;  %2430 = vmatmul.msk.bf16.gmra.mxu1 %vm276_vm2, %v1938_v37 }
 0x254   : > { %v1390_v5 = vadd.f32 %v1351_v27, %v1320_v11 }
 0x255   : > { %v1539_v34 = vpop.f32.mrf.mxu0 }
 0x256   : > { %v1508_v18 = vadd.f32 %v3434_v51, %v1390_v5 }
 0x258   : > { %v1578_v58 = vadd.f32 %v1539_v34, %v1508_v18  ;;  %2401 = vmatmul.msk.bf16.gmra.mxu2 %vm276_vm2, %v1676_v54  ;;  %v1624_v54 = vpop.f32.mrf.mxu1  ;;  %v1940_v34 = vpop.permute.xlu2 %1939 }
 0x25a   : > { %v3531_v41 = vadd.f32 %v1609_v1, %v1578_v58 }
 0x25b   : > { %v1354_v46 = vpop.f32.mrf.mxu2 }
 0x25c   : > { %v1391_v9 = vadd.f32 %v1354_v46, %v1321_v23  ;;  %v1324_v23 = vadd.f32 %v3309_v24, %v3408_v55  ;;  %v1682_v46 = vpop.permute.xlu1 %1681 }
 0x25d   : > { %v1542_v47 = vpop.f32.mrf.mxu0 }
 0x25e   : > { %v1509_v32 = vadd.f32 %v3447_v19, %v1391_v9  ;;  %v3545_v19 = vpop.f32.mrf.mxu3 }
 0x260   : > { %v1579_v51 = vadd.f32 %v1542_v47, %v1509_v32  ;;  %2419 = vmatmul.msk.bf16.gmra.mxu0 %vm276_vm2, %v2888_v33  ;;  %v1627_v5 = vpop.f32.mrf.mxu1  ;;  %v1323_v33 = vadd.f32 %v3280_v35, %v3397_v6 }
 0x262   : > { %v3541_v1 = vadd.f32 %v1612_v53, %v1579_v51 }
 0x263   : > { %v1356_v13 = vpop.f32.mrf.mxu2  ;;  %2431 = vmatmul.msk.bf16.gmra.mxu1 %vm276_vm2, %v1940_v34 }
 0x264   : > { %v1392_v60 = vadd.f32 %v1356_v13, %v1322_v4  ;;  %v1942_v51 = vpop.permute.xlu1 %1941 }
 0x265   : > { %v1544_v31 = vpop.f32.mrf.mxu0 }
 0x266   : > { %v1510_v11 = vadd.f32 %v3460_v0, %v1392_v60  ;;  %v1492_v6 = vpop.f32.mrf.mxu3 }
 0x268   : > { %v1580_v27 = vadd.f32 %v1544_v31, %v1510_v11  ;;  %2402 = vmatmul.msk.bf16.gmra.mxu2 %vm276_vm2, %v1678_v3  ;;  %v1629_v3 = vpop.f32.mrf.mxu1  ;;  %v1684_v11 = vpop.permute.xlu0 %1683 }
 0x26a   : > { %v3549_v18 = vadd.f32 %v1614_v56, %v1580_v27 }
 0x26b   : > { %v1359_v61 = vpop.f32.mrf.mxu2 }
 0x26c   : > { %v1393_v52 = vadd.f32 %v1359_v61, %v1323_v33 }
 0x26d   : > { %v1547_v53 = vpop.f32.mrf.mxu0 }
 0x26e   : > { %v1511_v58 = vadd.f32 %v3472_v25, %v1393_v52 }
 0x270   : > { %v1581_v0 = vadd.f32 %v1547_v53, %v1511_v58  ;;  %2420 = vmatmul.msk.bf16.gmra.mxu0 %vm276_vm2, %v2904_v20  ;;  %v1632_v25 = vpop.f32.mrf.mxu1  ;;  %v1325_v20 = vadd.f32 %v3327_v8, %v3419_v42 }
 0x272   : > { %v3557_v35 = vadd.f32 %v1617_v63, %v1581_v0  ;;  %v1494_v63 = vpop.f32.mrf.mxu3 }
 0x273   : > { %v1361_v56 = vpop.f32.mrf.mxu2  ;;  %2432 = vmatmul.msk.bf16.gmra.mxu1 %vm276_vm2, %v1942_v51 }
 0x274   : > { %v1394_v9 = vadd.f32 %v1361_v56, %v1324_v23  ;;  %v1328_v23 = vadd.f32 %v3381_v17, %v3454_v21 }
 0x275   : > { %v1549_v37 = vpop.f32.mrf.mxu0 }
 0x276   : > { %v1512_v47 = vadd.f32 %v3486_v14, %v1394_v9 }
 0x278   : > { %v1582_v32 = vadd.f32 %v1549_v37, %v1512_v47  ;;  %2403 = vmatmul.msk.bf16.gmra.mxu2 %vm276_vm2, %v1680_v36  ;;  %v1634_v14 = vpop.f32.mrf.mxu1  ;;  %v1326_v36 = vadd.f32 %v3339_v43, %v3430_v22  ;;  %v1944_v22 = vpop.permute.xlu0 %1943 }
 0x27a   : > { %v3563_v4 = vadd.f32 %v1619_v48, %v1582_v32  ;;  %v1497_v34 = vpop.f32.mrf.mxu3 }
 0x27b   : > { %v1364_v24 = vpop.f32.mrf.mxu2 }
 0x27c   : > { %v1395_v55 = vadd.f32 %v1364_v24, %v1325_v20 }
 0x27d   : > { %v1552_v13 = vpop.f32.mrf.mxu0 }
 0x27e   : > { %v1513_v60 = vadd.f32 %v3499_v39, %v1395_v55  ;;  %v1327_v39 = vadd.f32 %v3370_v16, %v3441_v44  ;;  %v1686_v16 = vpop.permute.xlu2 %1685 }
 0x280   : > { %v1583_v31 = vadd.f32 %v1552_v13, %v1513_v60  ;;  %2421 = vmatmul.msk.bf16.gmra.mxu0 %vm276_vm2, %v2930_v57  ;;  %v1637_v53 = vpop.f32.mrf.mxu1 }
 0x282   : > { %v3571_v8 = vadd.f32 %v1622_v45, %v1583_v31 }
 0x283   : > { %v1366_v42 = vpop.f32.mrf.mxu2  ;;  %2433 = vmatmul.msk.bf16.gmra.mxu1 %vm276_vm2, %v1944_v22 }
 0x284   : > { %v1396_v48 = vadd.f32 %v1366_v42, %v1326_v36 }
 0x285   : > { %v1554_v27 = vpop.f32.mrf.mxu0 }
 0x286   : > { %v1514_v33 = vadd.f32 %v3509_v10, %v1396_v48  ;;  %v1499_v10 = vpop.f32.mrf.mxu3 }
 0x288   : > { %v1584_v61 = vadd.f32 %v1554_v27, %v1514_v33  ;;  %2404 = vmatmul.msk.bf16.gmra.mxu2 %vm276_vm2, %v1682_v46  ;;  %v1639_v9 = vpop.f32.mrf.mxu1 }
 0x28a   : > { %v3577_v57 = vadd.f32 %v1624_v54, %v1584_v61 }
 0x28b   : > { %v1369_v52 = vpop.f32.mrf.mxu2 }
 0x28c   : > { %v1397_v43 = vadd.f32 %v1369_v52, %v1327_v39 }
 0x28d   : > { %v1557_v45 = vpop.f32.mrf.mxu0 }
 0x28e   : > { %v1515_v58 = vadd.f32 %v3535_v30, %v1397_v43  ;;  %v1329_v30 = vadd.f32 %v3395_v49, %v3463_v26  ;;  %v1502_v20 = vpop.f32.mrf.mxu3 }
 0x290   : > { %v1585_v0 = vadd.f32 %v1557_v45, %v1515_v58  ;;  %2422 = vmatmul.msk.bf16.gmra.mxu0 %vm276_vm2, %v2956_v62  ;;  %v1946_v62 = vpop.permute.xlu2 %1945  ;;  %v1642_v24 = vpop.f32.mrf.mxu1  ;;  %v3838_v58 = vld [vmem:[#allocation3_spill] sm:$0xff] }
 0x292   : > { %v3585_v44 = vadd.f32 %v1627_v5, %v1585_v0  ;;  %v1333_v0 = vadd.f32 %v3838_v58, %v3503_v28 }
 0x293   : > { %v1371_v54 = vpop.f32.mrf.mxu2  ;;  %2434 = vmatmul.msk.bf16.gmra.mxu1 %vm276_vm2, %v1946_v62 }
 0x294   : > { %v1398_v46 = vadd.f32 %v1371_v54, %v1328_v23 }
 0x295   : > { %v1559_v56 = vpop.f32.mrf.mxu0 }
 0x296   : > { %v1516_v37 = vadd.f32 %v3545_v19, %v1398_v46  ;;  %v1330_v19 = vadd.f32 %v3412_v38, %v3474_v15  ;;  %v3839_v46 = vld [vmem:[#allocation48_spill] sm:$0xff] }
 0x298   : > { %v1586_v47 = vadd.f32 %v1559_v56, %v1516_v37  ;;  %2405 = vmatmul.msk.bf16.gmra.mxu2 %vm276_vm2, %v1684_v11  ;;  %v1644_v42 = vpop.f32.mrf.mxu1 }
 0x29a   : > { %v3591_v32 = vadd.f32 %v1629_v3, %v1586_v47  ;;  %v1504_v3 = vpop.f32.mrf.mxu3 }
 0x29b   : > { %v1374_v17 = vpop.f32.mrf.mxu2 }
 0x29c   : > { %v1399_v21 = vadd.f32 %v1374_v17, %v1329_v30 }
 0x29d   : > { %v1562_v5 = vpop.f32.mrf.mxu0 }
 0x29e   : > { %v1517_v51 = vadd.f32 %v1492_v6, %v1399_v21  ;;  %v3837_v6 = vld [vmem:[#allocation5_spill] sm:$0xff] }
 0x29f   : > { %v1331_v48 = vadd.f32 %v3837_v6, %v3482_v29 }
 0x2a0   : > { %v1587_v55 = vadd.f32 %v1562_v5, %v1517_v51  ;;  %2423 = vmatmul.msk.bf16.gmra.mxu0 %vm276_vm2, %v2980_v7  ;;  %v1983_v52 = vpop.f32.mrf.mxu1 }
 0x2a2   : > { %v3598_v13 = vadd.f32 %v1632_v25, %v1587_v55  ;;  %v1795_v15 = vpop.f32.mrf.mxu3 }
 0x2a3   : > { %v1376_v49 = vpop.f32.mrf.mxu2 }
 0x2a4   : > { %v1400_v26 = vadd.f32 %v1376_v49, %v1330_v19 }
 0x2a5   : > { %v1564_v60 = vpop.f32.mrf.mxu0 }
 0x2a6   : > { %v1518_v31 = vadd.f32 %v1494_v63, %v1400_v26  ;;  %v1332_v63 = vadd.f32 %v3438_v59, %v3493_v2  ;;  %v3632_v26 = vld [vmem:[%s3715_s3] ss:$0 sm:$0xff] }
 0x2a8   : > { %v1588_v36 = vadd.f32 %v1564_v60, %v1518_v31  ;;  %2406 = vmatmul.msk.bf16.gmra.mxu2 %vm276_vm2, %v1686_v16  ;;  %v1985_v2 = vpop.f32.mrf.mxu1 }
 0x2aa   : > { %v3603_v11 = vadd.f32 %v1634_v14, %v1588_v36  ;;  %v1688_v14 = vpop.permute.xlu1 %1687 }
 0x2ab   : > { %v1379_v7 = vpop.f32.mrf.mxu2 }
 0x2ac   : > { %v1401_v27 = vadd.f32 %v1379_v7, %v1331_v48 }
 0x2ad   : > { %v1567_v33 = vpop.f32.mrf.mxu0 }
 0x2ae   : > { %v1519_v38 = vadd.f32 %v1497_v34, %v1401_v27  ;;  %v1797_v34 = vpop.f32.mrf.mxu3 }
 0x2b0   : > { %v1589_v25 = vadd.f32 %v1567_v33, %v1519_v38  ;;  %2424 = vmatmul.msk.bf16.gmra.mxu0 %vm276_vm2, %v3795_v50 }
 0x2b2   : > { %v3609_v61 = vadd.f32 %v1637_v53, %v1589_v25 }
 0x2b3   : > { %v1381_v39 = vpop.f32.mrf.mxu2 }
 0x2b4   : > { %v1402_v43 = vadd.f32 %v1381_v39, %v1332_v63 }
 0x2b5   : > { %v1569_v29 = vpop.f32.mrf.mxu0 }
 0x2b6   : > { %v1520_v22 = vadd.f32 %v1499_v10, %v1402_v43  ;;  %v1800_v10 = vpop.f32.mrf.mxu3 }
 0x2b8   : > { %v1590_v45 = vadd.f32 %v1569_v29, %v1520_v22  ;;  %2407 = vmatmul.msk.bf16.gmra.mxu2 %vm276_vm2, %v1688_v14 }
 0x2ba   : > { %v3614_v23 = vadd.f32 %v1639_v9, %v1590_v45  ;;  %v1988_v9 = vpop.f32.mrf.mxu1 }
 0x2bb   : > { %v1384_v50 = vpop.f32.mrf.mxu2 }
 0x2bc   : > { %v1403_v16 = vadd.f32 %v1384_v50, %v1333_v0 }
 0x2bd   : > { %v1572_v59 = vpop.f32.mrf.mxu0 }
 0x2be   : > { %v1521_v53 = vadd.f32 %v1502_v20, %v1403_v16  ;;  %v1802_v5 = vpop.f32.mrf.mxu3 }
 0x2c0   : > { %v1591_v54 = vadd.f32 %v1572_v59, %v1521_v53  ;;  %2425 = vmatmul.msk.bf16.gmra.mxu0 %vm276_vm2, %v3839_v46 }
 0x2c2   : > { %v3618_v56 = vadd.f32 %v1642_v24, %v1591_v54  ;;  %v3627_v24 = vld [vmem:[%s3714_s2] ss:$0 sm:$0xff] }
 0x2c3   : > { %v1386_v37 = vpop.f32.mrf.mxu2 }
 0x2c4   : > { %v1404_v47 = vadd.f32 %v1386_v37, %v3517_v40  ;;  %v1990_v40 = vpop.f32.mrf.mxu1 }
 0x2c5   : > { %v1574_v30 = vpop.f32.mrf.mxu0 }
 0x2c6   : > { %v1522_v28 = vadd.f32 %v1504_v3, %v1404_v47  ;;  %v1805_v6 = vpop.f32.mrf.mxu3 }
 0x2c8   : > { %v1592_v62 = vadd.f32 %v1574_v30, %v1522_v28 }
 0x2ca   : > { %v3621_v17 = vadd.f32 %v1644_v42, %v1592_v62 }
 0x2cb   : > { %v1725_v21 = vpop.f32.mrf.mxu2 }
 0x2cc   : > { %v1765_v20 = vadd.f32 %v1725_v21, %v3525_v12  ;;  %v1993_v38 = vpop.f32.mrf.mxu1 }
 0x2cd   : > { %v1865_v51 = vpop.f32.mrf.mxu0 }
 0x2ce   : > { %v1835_v55 = vadd.f32 %v1795_v15, %v1765_v20  ;;  %v1807_v29 = vpop.f32.mrf.mxu3 }
 0x2d0   : > { %v1905_v19 = vadd.f32 %v1865_v51, %v1835_v55 }
 0x2d2   : > { %v2023_v49 = vadd.f32 %v1983_v52, %v1905_v19 }
 0x2d3   : > { %v1727_v3 = vpop.f32.mrf.mxu2 }
 0x2d4   : > { %v2043_v12 = vmul.f32 %v3627_v24, %v2023_v49  ;;  %v1766_v60 = vadd.f32 %v1727_v3, %v3531_v41  ;;  %v1995_v0 = vpop.f32.mrf.mxu1 }
 0x2d5   : > { %v1867_v31 = vpop.f32.mrf.mxu0 }
 0x2d6   : > { %v2063_v36 = vadd.f32 %v3632_v26, %v2043_v12  ;;  %v1836_v42 = vadd.f32 %v1797_v34, %v1766_v60  ;;  %v1810_v53 = vpop.f32.mrf.mxu3 }
 0x2d8   : > { %v2079_v48 = vmax.f32 %v2063_v36, 0.0  ;;  %v1906_v7 = vadd.f32 %v1867_v31, %v1836_v42 }
 0x2da   : > { %2095 = vst [vmem:[%s3641_s23] sm:$0xff] %v2079_v48  ;;  %v2024_v27 = vadd.f32 %v1985_v2, %v1906_v7 }
 0x2db   : > { %v1730_v33 = vpop.f32.mrf.mxu2 }
 0x2dc   : > { %v2044_v41 = vmul.f32 %v3627_v24, %v2024_v27  ;;  %v1767_v15 = vadd.f32 %v1730_v33, %v3541_v1  ;;  %v1998_v30 = vpop.f32.mrf.mxu1 }
 0x2dd   : > { %v1870_v25 = vpop.f32.mrf.mxu0 }
 0x2de   : > { %v2064_v63 = vadd.f32 %v3632_v26, %v2044_v41  ;;  %v1837_v39 = vadd.f32 %v1800_v10, %v1767_v15  ;;  %v1812_v51 = vpop.f32.mrf.mxu3 }
 0x2e0   : > { %v2080_v52 = vmax.f32 %v2064_v63, 0.0  ;;  %v1907_v43 = vadd.f32 %v1870_v25, %v1837_v39 }
 0x2e2   : > { %2096 = vst [vmem:[%s3641_s23 + $0x8] sm:$0xff] %v2080_v52  ;;  %v2025_v14 = vadd.f32 %v1988_v9, %v1907_v43 }
 0x2e3   : > { %v1732_v22 = vpop.f32.mrf.mxu2 }
 0x2e4   : > { %v2045_v45 = vmul.f32 %v3627_v24, %v2025_v14  ;;  %v1768_v34 = vadd.f32 %v1732_v22, %v3549_v18  ;;  %v2000_v3 = vpop.f32.mrf.mxu1 }
 0x2e5   : > { %v1872_v58 = vpop.f32.mrf.mxu0 }
 0x2e6   : > { %v2065_v50 = vadd.f32 %v3632_v26, %v2045_v45  ;;  %v1838_v1 = vadd.f32 %v1802_v5, %v1768_v34  ;;  %v1815_v48 = vpop.f32.mrf.mxu3 }
 0x2e8   : > { %v2081_v16 = vmax.f32 %v2065_v50, 0.0  ;;  %v1908_v59 = vadd.f32 %v1872_v58, %v1838_v1 }
 0x2ea   : > { %2097 = vst [vmem:[%s3641_s23 + $0x10] sm:$0xff] %v2081_v16  ;;  %v2026_v2 = vadd.f32 %v1990_v40, %v1908_v59 }
 0x2eb   : > { %v1735_v54 = vpop.f32.mrf.mxu2 }
 0x2ec   : > { %v2046_v46 = vmul.f32 %v3627_v24, %v2026_v2  ;;  %v1769_v10 = vadd.f32 %v1735_v54, %v3557_v35  ;;  %v2003_v41 = vpop.f32.mrf.mxu1 }
 0x2ed   : > { %v1875_v37 = vpop.f32.mrf.mxu0 }
 0x2ee   : > { %v2066_v47 = vadd.f32 %v3632_v26, %v2046_v46  ;;  %v1839_v18 = vadd.f32 %v1805_v6, %v1769_v10 }
 0x2f0   : > { %v2082_v28 = vmax.f32 %v2066_v47, 0.0  ;;  %v1909_v9 = vadd.f32 %v1875_v37, %v1839_v18 }
 0x2f2   : > { %2098 = vst [vmem:[%s3641_s23 + $0x18] sm:$0xff] %v2082_v28  ;;  %v2027_v62 = vadd.f32 %v1993_v38, %v1909_v9 }
 0x2f3   : > { %v1737_v21 = vpop.f32.mrf.mxu2 }
 0x2f4   : > { %v2047_v20 = vmul.f32 %v3627_v24, %v2027_v62  ;;  %v1770_v5 = vadd.f32 %v1737_v21, %v3563_v4 }
 0x2f5   : > { %v1877_v55 = vpop.f32.mrf.mxu0 }
 0x2f6   : > { %v2067_v19 = vadd.f32 %v3632_v26, %v2047_v20  ;;  %v1840_v35 = vadd.f32 %v1807_v29, %v1770_v5  ;;  %v1817_v29 = vpop.f32.mrf.mxu3 }
 0x2f8   : > { %v2083_v40 = vmax.f32 %v2067_v19, 0.0  ;;  %v1910_v49 = vadd.f32 %v1877_v55, %v1840_v35 }
 0x2fa   : > { %2099 = vst [vmem:[%s3641_s23 + $0x20] sm:$0xff] %v2083_v40  ;;  %v2028_v12 = vadd.f32 %v1995_v0, %v1910_v49  ;;  %v2005_v0 = vpop.f32.mrf.mxu1 }
 0x2fb   : > { %v1740_v60 = vpop.f32.mrf.mxu2 }
 0x2fc   : > { %v2048_v31 = vmul.f32 %v3627_v24, %v2028_v12  ;;  %v1771_v36 = vadd.f32 %v1740_v60, %v3571_v8 }
 0x2fd   : > { %v1880_v42 = vpop.f32.mrf.mxu0 }
 0x2fe   : > { %v2068_v6 = vadd.f32 %v3632_v26, %v2048_v31  ;;  %v1841_v4 = vadd.f32 %v1810_v53, %v1771_v36  ;;  %v1820_v2 = vpop.f32.mrf.mxu3 }
 0x300   : > { %v2084_v7 = vmax.f32 %v2068_v6, 0.0  ;;  %v1911_v27 = vadd.f32 %v1880_v42, %v1841_v4 }
 0x302   : > { %2100 = vst [vmem:[%s3641_s23 + $0x28] sm:$0xff] %v2084_v7  ;;  %v2029_v33 = vadd.f32 %v1998_v30, %v1911_v27  ;;  %v2008_v47 = vpop.f32.mrf.mxu1 }
 0x303   : > { %v1742_v38 = vpop.f32.mrf.mxu2 }
 0x304   : > { %v2049_v15 = vmul.f32 %v3627_v24, %v2029_v33  ;;  %v1772_v25 = vadd.f32 %v1742_v38, %v3577_v57 }
 0x305   : > { %v1882_v63 = vpop.f32.mrf.mxu0 }
 0x306   : > { %v2069_v39 = vadd.f32 %v3632_v26, %v2049_v15  ;;  %v1842_v8 = vadd.f32 %v1812_v51, %v1772_v25  ;;  %v1822_v20 = vpop.f32.mrf.mxu3 }
 0x308   : > { %v2085_v52 = vmax.f32 %v2069_v39, 0.0  ;;  %v1912_v43 = vadd.f32 %v1882_v63, %v1842_v8 }
 0x30a   : > { %2101 = vst [vmem:[%s3641_s23 + $0x30] sm:$0xff] %v2085_v52  ;;  %v2030_v14 = vadd.f32 %v2000_v3, %v1912_v43  ;;  %v2010_v35 = vpop.f32.mrf.mxu1 }
 0x30b   : > { %v1745_v22 = vpop.f32.mrf.mxu2 }
 0x30c   : > { %v2050_v45 = vmul.f32 %v3627_v24, %v2030_v14  ;;  %v1773_v34 = vadd.f32 %v1745_v22, %v3585_v44 }
 0x30d   : > { %v1885_v58 = vpop.f32.mrf.mxu0 }
 0x30e   : > { %v2070_v50 = vadd.f32 %v3632_v26, %v2050_v45  ;;  %v1843_v57 = vadd.f32 %v1815_v48, %v1773_v34  ;;  %v1825_v36 = vpop.f32.mrf.mxu3 }
 0x310   : > { %v2086_v1 = vmax.f32 %v2070_v50, 0.0  ;;  %v1913_v16 = vadd.f32 %v1885_v58, %v1843_v57 }
 0x312   : > { %2102 = vst [vmem:[%s3641_s23 + $0x38] sm:$0xff] %v2086_v1  ;;  %v2031_v59 = vadd.f32 %v2003_v41, %v1913_v16  ;;  %v2013_v48 = vpop.f32.mrf.mxu1 }
 0x313   : > { %v1747_v53 = vpop.f32.mrf.mxu2 }
 0x314   : > { %v2051_v54 = vmul.f32 %v3627_v24, %v2031_v59  ;;  %v1774_v46 = vadd.f32 %v1747_v53, %v3591_v32 }
 0x315   : > { %v1887_v10 = vpop.f32.mrf.mxu0 }
 0x316   : > { %v2071_v37 = vadd.f32 %v3632_v26, %v2051_v54  ;;  %v1844_v44 = vadd.f32 %v1817_v29, %v1774_v46  ;;  %v1827_v63 = vpop.f32.mrf.mxu3 }
 0x318   : > { %v2087_v18 = vmax.f32 %v2071_v37, 0.0  ;;  %v1914_v30 = vadd.f32 %v1887_v10, %v1844_v44 }
 0x31a   : > { %2103 = vst [vmem:[%s3641_s23 + $0x40] sm:$0xff] %v2087_v18  ;;  %v2032_v28 = vadd.f32 %v2005_v0, %v1914_v30  ;;  %v2015_v29 = vpop.f32.mrf.mxu1 }
 0x31b   : > { %v1750_v9 = vpop.f32.mrf.mxu2 }
 0x31c   : > { %v2052_v62 = vmul.f32 %v3627_v24, %v2032_v28  ;;  %v1775_v21 = vadd.f32 %v1750_v9, %v3598_v13 }
 0x31d   : > { %v1890_v5 = vpop.f32.mrf.mxu0 }
 0x31e   : > { %v2072_v51 = vadd.f32 %v3632_v26, %v2052_v62  ;;  %v1845_v32 = vadd.f32 %v1820_v2, %v1775_v21  ;;  %v1830_v0 = vpop.f32.mrf.mxu3 }
 0x320   : > { %v2088_v55 = vmax.f32 %v2072_v51, 0.0  ;;  %v1915_v19 = vadd.f32 %v1890_v5, %v1845_v32 }
 0x322   : > { %2104 = vst [vmem:[%s3641_s23 + $0x48] sm:$0xff] %v2088_v55  ;;  %v2033_v40 = vadd.f32 %v2008_v47, %v1915_v19  ;;  %v2018_v2 = vpop.f32.mrf.mxu1 }
 0x323   : > { %v1752_v49 = vpop.f32.mrf.mxu2 }
 0x324   : > { %v2053_v3 = vmul.f32 %v3627_v24, %v2033_v40  ;;  %v1776_v12 = vadd.f32 %v1752_v49, %v3603_v11 }
 0x325   : > { %v1892_v60 = vpop.f32.mrf.mxu0 }
 0x326   : > { %v2073_v31 = vadd.f32 %v3632_v26, %v2053_v3  ;;  %v1846_v13 = vadd.f32 %v1822_v20, %v1776_v12  ;;  %v1832_v47 = vpop.f32.mrf.mxu3 }
 0x328   : > { %v2089_v42 = vmax.f32 %v2073_v31, 0.0  ;;  %v1916_v6 = vadd.f32 %v1892_v60, %v1846_v13 }
 0x32a   : > { %2105 = vst [vmem:[%s3641_s23 + $0x50] sm:$0xff] %v2089_v42  ;;  %v2034_v4 = vadd.f32 %v2010_v35, %v1916_v6  ;;  %v2020_v62 = vpop.f32.mrf.mxu1 }
 0x32b   : > { %v1755_v7 = vpop.f32.mrf.mxu2 }
 0x32c   : > { %v2054_v27 = vmul.f32 %v3627_v24, %v2034_v4  ;;  %v1777_v33 = vadd.f32 %v1755_v7, %v3609_v61 }
 0x32d   : > { %v1895_v38 = vpop.f32.mrf.mxu0 }
 0x32e   : > { %v2074_v41 = vadd.f32 %v3632_v26, %v2054_v27  ;;  %v1847_v11 = vadd.f32 %v1825_v36, %v1777_v33 }
 0x330   : > { %v2090_v15 = vmax.f32 %v2074_v41, 0.0  ;;  %v1917_v25 = vadd.f32 %v1895_v38, %v1847_v11 }
 0x332   : > { %2106 = vst [vmem:[%s3641_s23 + $0x58] sm:$0xff] %v2090_v15  ;;  %v2035_v39 = vadd.f32 %v2013_v48, %v1917_v25 }
 0x333   : > { %v1757_v8 = vpop.f32.mrf.mxu2 }
 0x334   : > { %v2055_v52 = vmul.f32 %v3627_v24, %v2035_v39  ;;  %v1778_v43 = vadd.f32 %v1757_v8, %v3614_v23 }
 0x335   : > { %v1897_v14 = vpop.f32.mrf.mxu0 }
 0x336   : > { %v2075_v22 = vadd.f32 %v3632_v26, %v2055_v52  ;;  %v1848_v61 = vadd.f32 %v1827_v63, %v1778_v43 }
 0x338   : > { %v2091_v45 = vmax.f32 %v2075_v22, 0.0  ;;  %v1918_v34 = vadd.f32 %v1897_v14, %v1848_v61 }
 0x33a   : > { %2107 = vst [vmem:[%s3641_s23 + $0x60] sm:$0xff] %v2091_v45  ;;  %v2036_v58 = vadd.f32 %v2015_v29, %v1918_v34 }
 0x33b   : > { %v1760_v50 = vpop.f32.mrf.mxu2 }
 0x33c   : > { %v2056_v57 = vmul.f32 %v3627_v24, %v2036_v58  ;;  %v1779_v1 = vadd.f32 %v1760_v50, %v3618_v56 }
 0x33d   : > { %v1900_v16 = vpop.f32.mrf.mxu0 }
 0x33e   : > { %v2076_v59 = vadd.f32 %v3632_v26, %v2056_v57  ;;  %v1849_v23 = vadd.f32 %v1830_v0, %v1779_v1 }
 0x340   : > { %v2092_v53 = vmax.f32 %v2076_v59, 0.0  ;;  %v1919_v54 = vadd.f32 %v1900_v16, %v1849_v23 }
 0x342   : > { %2108 = vst [vmem:[%s3641_s23 + $0x68] sm:$0xff] %v2092_v53  ;;  %v2037_v46 = vadd.f32 %v2018_v2, %v1919_v54 }
 0x343   : > { %v1762_v10 = vpop.f32.mrf.mxu2 }
 0x344   : > { %v2057_v37 = vmul.f32 %v3627_v24, %v2037_v46  ;;  %v1780_v44 = vadd.f32 %v1762_v10, %v3621_v17 }
 0x345   : > { %v1902_v30 = vpop.f32.mrf.mxu0 }
 0x346   : > { %v2077_v18 = vadd.f32 %v3632_v26, %v2057_v37  ;;  %v1850_v56 = vadd.f32 %v1832_v47, %v1780_v44 }
 0x348   : > { %v2093_v28 = vmax.f32 %v2077_v18, 0.0  ;;  %v1920_v9 = vadd.f32 %v1902_v30, %v1850_v56 }
 0x34a   : > { %2109 = vst [vmem:[%s3641_s23 + $0x70] sm:$0xff] %v2093_v28  ;;  %v2038_v21 = vadd.f32 %v2020_v62, %v1920_v9 }
 0x34c   : > { %v2058_v20 = vmul.f32 %v3627_v24, %v2038_v21 }
 0x34e   : > { %v2078_v5 = vadd.f32 %v3632_v26, %v2058_v20 }
 0x350   : > { %v2094_v51 = vmax.f32 %v2078_v5, 0.0 }
 0x352   : > { %2110 = vst [vmem:[%s3641_s23 + $0x78] sm:$0xff] %v2094_v51 }
 0x353 PF: > { %s14_s17 = sadd.s32 1, %s2491_s17   ;;  %s3840_s15 = smov %s2487_s16 }
 0x354   : > { %p11_p5 = scmp.ge.s32.totalorder %s14_s17, 4   ;;  %s3841_s16 = smov %s3843_s18 }
 0x356   :  { %13 = sbr.rel (!%p11_p5) target bundleno = 2 (0x2), region = 86 }

</bundles_post_ra>
